<compile_context>
chip_gen: v7x
topology: tpu7x:2x2x1
jax: 0.10.0
libtpu: 0.0.40
codegen_flags: <defaults>
</compile_context>

<pallas_src>
import jax
import jax.numpy as jnp
from jax.experimental import pallas as pl
from jax.experimental.pallas import tpu as pltpu


def _round_up(x, m):
    return ((x + m - 1) // m) * m


def _vmem_budget_and_limit():
    """Generation-aware VMEM budget (working set) and scoped limit."""
    try:
        cap = int(pltpu.get_tpu_info().vmem_capacity_bytes)
    except Exception:
        cap = 64 * 1024 * 1024  # conservative (v7x) fallback
    limit = min(cap // 2, 64 * 1024 * 1024)   # 64 MiB on v5e/v6e, 32 MiB on v7x
    budget = limit // 2                       # double-buffered working set
    return budget, limit


def _choose_tile_n(n, c, itemsize, budget_bytes, align):
    """Largest aligned row tile whose double-buffered working set fits budget."""
    c_lanes = _round_up(c, 128)  # VMEM blocks lane-pad the minor dim to 128
    # dbuf logits + dbuf lane-padded int32 targets (128 lanes * 4 B / row / buf)
    per_row = 2 * (c_lanes * itemsize + 128 * 4)
    # in-kernel f32 temporaries (x_f32, z, exp(z), one-hot select)
    per_row += 4 * c_lanes * 4
    tile = budget_bytes // per_row
    tile = int(min(tile, 2048, _round_up(n, align)))
    tile = max(align, (tile // align) * align)
    return tile


def _focal_loss_kernel(alpha, gamma, n_valid, tile_n, tiles_per_shard):
    def kernel(logits_ref, targets_ref, out_ref, acc_ref):
        p = pl.program_id(0)           # shard (parallel across TCs on v7x)
        i = pl.program_id(1)           # row-tile within shard (reduction)

        @pl.when(i == 0)
        def _():
            acc_ref[...] = jnp.zeros_like(acc_ref)

        # Upcast in-kernel (no wrapper-side cast / extra HBM copy).
        x = logits_ref[...].astype(jnp.float32)   # (TILE_N, C) f32
        t = targets_ref[...]                      # (TILE_N, 1)  i32

        # Numerically stable softmax denominator (single full-width exp).
        m = jnp.max(x, axis=-1, keepdims=True)                       # (TILE_N, 1)
        sum_exp = jnp.sum(jnp.exp(x - m), axis=-1, keepdims=True)    # (TILE_N, 1)
        lse = jnp.log(sum_exp) + m

        # Gather the target-class logit via a one-hot compare (no dyn gather).
        col = jax.lax.broadcasted_iota(jnp.int32, x.shape, 1)        # (TILE_N, C)
        picked = jnp.sum(jnp.where(col == t, x, 0.0), axis=-1, keepdims=True)

        ce = lse - picked                                            # cross entropy
        # pt = exp(-ce) rewritten to reuse sum_exp: only narrow exp + reciprocal.
        pt = jnp.exp(picked - m) * pl.reciprocal(sum_exp, approx=False)
        one_minus_pt = jnp.maximum(1.0 - pt, 0.0)  # clamp: avoid pow NaN on noise

        if gamma == 2.0:                           # module default: 1 VPU multiply
            w = one_minus_pt * one_minus_pt
        elif gamma == 1.0:
            w = one_minus_pt
        elif gamma == 0.0:
            w = jnp.ones_like(one_minus_pt)
        else:
            w = one_minus_pt ** gamma

        focal = alpha * w * ce                     # (TILE_N, 1)

        # Mask rows past the true sample count.  Uses the UNCLAMPED logical row
        # offset, so duplicated (index-clamped) tail tiles contribute exactly 0.
        base = (p * tiles_per_shard + i) * tile_n
        row = jax.lax.broadcasted_iota(jnp.int32, focal.shape, 0) + base
        focal = jnp.where(row < n_valid, focal, 0.0)

        acc_ref[...] = acc_ref[...] + jnp.sum(focal)

        @pl.when(i == pl.num_programs(1) - 1)
        def _():
            out_ref[...] = acc_ref[...]            # per-shard partial sum

    return kernel


def focal_loss(inputs, targets, alpha=0.25, gamma=2.0, tile_n=None):
    """inputs: (N, C) float logits (any float dtype); targets: (N,) int class ids."""
    n, c = inputs.shape
    dtype = jnp.dtype(inputs.dtype)

    budget_bytes, vmem_limit = _vmem_budget_and_limit()
    align = max(8, 32 // dtype.itemsize)          # 8 f32 / 16 bf16 / 32 int8-fp8

    if tile_n is None:
        tile_n = _choose_tile_n(n, c, dtype.itemsize, budget_bytes, align)
    tile_n = max(align, (int(tile_n) // align) * align)

    num_tiles = pl.cdiv(n, tile_n)
    num_shards = 2 if num_tiles >= 2 else 1       # v7x: 2 TCs; serial on v5e/v6e
    tiles_per_shard = pl.cdiv(num_tiles, num_shards)
    grid = (num_shards, tiles_per_shard)

    targets2d = targets.reshape(n, 1).astype(jnp.int32)

    def row_block(p, i):
        # Clamp so the DMA never starts fully out of range; the in-kernel
        # logical-row mask zeroes any duplicated tile's contribution.
        return (jnp.minimum(p * tiles_per_shard + i, num_tiles - 1), 0)

    cost = pl.CostEstimate(
        flops=int(8 * n * c),
        transcendentals=int(n * c + 2 * n),
        bytes_accessed=int(n * c * dtype.itemsize + n * 4 + 4 * num_shards),
    )

    partials = pl.pallas_call(
        _focal_loss_kernel(float(alpha), float(gamma), n, tile_n, tiles_per_shard),
        out_shape=jax.ShapeDtypeStruct((num_shards, 1), jnp.float32),
        grid=grid,
        in_specs=[
            pl.BlockSpec((tile_n, c), row_block),   # full-C block: no 128 pad needed
            pl.BlockSpec((tile_n, 1), row_block),
        ],
        out_specs=pl.BlockSpec((1, 1), lambda p, i: (p, 0)),
        scratch_shapes=[pltpu.VMEM((1, 1), jnp.float32)],
        compiler_params=pltpu.CompilerParams(
            dimension_semantics=("parallel", "arbitrary"),
            vmem_limit_bytes=vmem_limit,
        ),
        cost_estimate=cost,
    )(inputs, targets2d)

    return jnp.sum(partials) / float(n)


def focal_loss_ref(inputs, targets, alpha=0.25, gamma=2.0):
    """Pure-JAX reference mirroring the PyTorch module."""
    logp = jax.nn.log_softmax(inputs.astype(jnp.float32), axis=-1)
    ce = -jnp.take_along_axis(logp, targets[:, None], axis=-1)[:, 0]
    pt = jnp.exp(-ce)
    return jnp.mean(alpha * (1.0 - pt) ** gamma * ce)


if __name__ == "__main__":
    key = jax.random.PRNGKey(0)
    k1, k2 = jax.random.split(key)

    # Small tabular-classification shapes (heart-disease style): 300 samples, 7 classes.
    N, C = 300, 7
    inputs = jax.random.normal(k1, (N, C), dtype=jnp.float32)
    targets = jax.random.randint(k2, (N,), 0, C, dtype=jnp.int32)

    # Default path: auto-sized single tile (grid (1, 1)).
    loss = focal_loss(inputs, targets, alpha=0.25, gamma=2.0)
    # Forced multi-tile path: 2 shards x 2 tiles with a ragged, index-clamped tail.
    loss_tiled = focal_loss(inputs, targets, alpha=0.25, gamma=2.0, tile_n=128)
    # bf16 streaming path (exercises dtype-aware 16-row alignment, in-kernel upcast).
    inputs_bf16 = inputs.astype(jnp.bfloat16)
    loss_bf16 = focal_loss(inputs_bf16, targets, alpha=0.25, gamma=2.0)
    jax.block_until_ready((loss, loss_tiled, loss_bf16))

    ref = focal_loss_ref(inputs, targets, alpha=0.25, gamma=2.0)
    ref_bf16 = focal_loss_ref(inputs_bf16, targets, alpha=0.25, gamma=2.0)
    assert jnp.allclose(loss, ref, atol=1e-5, rtol=1e-5), (loss, ref)
    assert jnp.allclose(loss_tiled, ref, atol=1e-5, rtol=1e-5), (loss_tiled, ref)
    assert jnp.allclose(loss_bf16, ref_bf16, atol=1e-4, rtol=1e-4), (loss_bf16, ref_bf16)

    print("KERNEL_OK")
</pallas_src>

<mosaic_0001>
module attributes {stable_mosaic.version = 11 : i64} {
  func.func @kernel(%arg0: i32, %arg1: i32, %arg2: memref<304x7xf32, #tpu.memory_space<vmem>>, %arg3: memref<304x1xi32, #tpu.memory_space<vmem>>, %arg4: memref<1x1xf32, #tpu.memory_space<vmem>>, %arg5: memref<1x1xf32, #tpu.memory_space<vmem>>) attributes {dimension_semantics = [#tpu.dimension_semantics<parallel>, #tpu.dimension_semantics<arbitrary>], iteration_bounds = array<i64: 1, 1>, scalar_prefetch = 0 : i64, scratch_operands = 1 : i64, tpu.core_type = #tpu.core_type<tc>, window_params = [{transform_indices = @transform_0, window_bounds = array<i64: 304, 7>}, {transform_indices = @transform_1, window_bounds = array<i64: 304, 1>}, {transform_indices = @transform_2, window_bounds = array<i64: 1, 1>}]} {
    %c0_i32 = arith.constant 0 : i32
    %0 = arith.cmpi eq, %arg1, %c0_i32 : i32
    %1 = arith.extui %0 : i1 to i32
    %c0_i32_0 = arith.constant 0 : i32
    %2 = arith.cmpi ne, %1, %c0_i32_0 : i32
    scf.if %2 {
      %cst_18 = arith.constant 0.000000e+00 : f32
      %55 = vector.broadcast %cst_18 : f32 to vector<1x1xf32>
      %c0_19 = arith.constant 0 : index
      %c0_20 = arith.constant 0 : index
      %56 = vector.load %arg5[%c0_19, %c0_20] : memref<1x1xf32, #tpu.memory_space<vmem>>, vector<1x1xf32>
      tpu.vector_store %arg5[%c0_19, %c0_20], %55 {strides = array<i32>} : memref<1x1xf32, #tpu.memory_space<vmem>>, vector<1x1xf32>,
    } else {
    }
    %c0 = arith.constant 0 : index
    %c0_1 = arith.constant 0 : index
    %3 = vector.load %arg2[%c0, %c0_1] : memref<304x7xf32, #tpu.memory_space<vmem>>, vector<304x7xf32>
    %c0_2 = arith.constant 0 : index
    %c0_3 = arith.constant 0 : index
    %4 = vector.load %arg3[%c0_2, %c0_3] : memref<304x1xi32, #tpu.memory_space<vmem>>, vector<304x1xi32>
    %cst = arith.constant dense<0xFF800000> : vector<304xf32>
    %5 = vector.multi_reduction <maximumf>, %3, %cst [1] : vector<304x7xf32> to vector<304xf32>
    %6 = vector.shape_cast %5 : vector<304xf32> to vector<304x1xf32>
    %7 = vector.broadcast %6 : vector<304x1xf32> to vector<304x7xf32>
    %8 = arith.subf %3, %7 : vector<304x7xf32>
    %9 = math.exp %8 : vector<304x7xf32>
    %cst_4 = arith.constant dense<0.000000e+00> : vector<304xf32>
    %10 = vector.multi_reduction <add>, %9, %cst_4 [1] : vector<304x7xf32> to vector<304xf32>
    %11 = vector.shape_cast %10 : vector<304xf32> to vector<304x1xf32>
    %12 = math.log %11 : vector<304x1xf32>
    %13 = arith.addf %12, %6 : vector<304x1xf32>
    %14 = tpu.iota {dimensions = array<i32: 1>} : vector<304x7xi32>
    %15 = vector.broadcast %4 : vector<304x1xi32> to vector<304x7xi32>
    %16 = arith.cmpi eq, %14, %15 : vector<304x7xi32>
    %cst_5 = arith.constant 0.000000e+00 : f32
    %17 = vector.broadcast %cst_5 : f32 to vector<304x7xf32>
    %18 = arith.select %16, %3, %17 : vector<304x7xi1>, vector<304x7xf32>
    %cst_6 = arith.constant dense<0.000000e+00> : vector<304xf32>
    %19 = vector.multi_reduction <add>, %18, %cst_6 [1] : vector<304x7xf32> to vector<304xf32>
    %20 = vector.shape_cast %19 : vector<304xf32> to vector<304x1xf32>
    %21 = arith.subf %13, %20 : vector<304x1xf32>
    %22 = arith.subf %20, %6 : vector<304x1xf32>
    %23 = math.exp %22 : vector<304x1xf32>
    %24 = tpu.reciprocal %11 : vector<304x1xf32> -> vector<304x1xf32>
    %25 = arith.mulf %23, %24 : vector<304x1xf32>
    %cst_7 = arith.constant 1.000000e+00 : f32
    %26 = vector.broadcast %cst_7 : f32 to vector<304x1xf32>
    %27 = arith.subf %26, %25 : vector<304x1xf32>
    %cst_8 = arith.constant 0.000000e+00 : f32
    %28 = vector.broadcast %cst_8 : f32 to vector<304x1xf32>
    %29 = arith.maximumf %27, %28 : vector<304x1xf32>
    %30 = arith.mulf %29, %29 : vector<304x1xf32>
    %cst_9 = arith.constant 2.500000e-01 : f32
    %31 = vector.broadcast %cst_9 : f32 to vector<304x1xf32>
    %32 = arith.mulf %31, %30 : vector<304x1xf32>
    %33 = arith.mulf %32, %21 : vector<304x1xf32>
    %c1_i32 = arith.constant 1 : i32
    %34 = arith.muli %arg0, %c1_i32 : i32
    %35 = arith.addi %34, %arg1 : i32
    %c304_i32 = arith.constant 304 : i32
    %36 = arith.muli %35, %c304_i32 : i32
    %37 = tpu.iota {dimensions = array<i32: 0>} : vector<304x1xi32>
    %38 = vector.broadcast %36 : i32 to vector<304x1xi32>
    %39 = arith.addi %37, %38 : vector<304x1xi32>
    %c300_i32 = arith.constant 300 : i32
    %40 = vector.broadcast %c300_i32 : i32 to vector<304x1xi32>
    %41 = arith.cmpi slt, %39, %40 : vector<304x1xi32>
    %cst_10 = arith.constant 0.000000e+00 : f32
    %42 = vector.broadcast %cst_10 : f32 to vector<304x1xf32>
    %43 = arith.select %41, %33, %42 : vector<304x1xi1>, vector<304x1xf32>
    %c0_11 = arith.constant 0 : index
    %c0_12 = arith.constant 0 : index
    %44 = vector.load %arg5[%c0_11, %c0_12] : memref<1x1xf32, #tpu.memory_space<vmem>>, vector<1x1xf32>
    %45 = vector.shape_cast %43 : vector<304x1xf32> to vector<1x304x1xf32>
    %cst_13 = arith.constant dense<0.000000e+00> : vector<1xf32>
    %46 = vector.multi_reduction <add>, %45, %cst_13 [1, 2] : vector<1x304x1xf32> to vector<1xf32>
    %47 = vector.shape_cast %46 : vector<1xf32> to vector<1x1x1xf32>
    %48 = vector.extract %47[0, 0, 0] : f32 from vector<1x1x1xf32>
    %49 = vector.broadcast %48 : f32 to vector<1x1xf32>
    %50 = arith.addf %44, %49 : vector<1x1xf32>
    %c0_14 = arith.constant 0 : index
    %c0_15 = arith.constant 0 : index
    %51 = vector.load %arg5[%c0_14, %c0_15] : memref<1x1xf32, #tpu.memory_space<vmem>>, vector<1x1xf32>
    tpu.vector_store %arg5[%c0_14, %c0_15], %50 {strides = array<i32>} : memref<1x1xf32, #tpu.memory_space<vmem>>, vector<1x1xf32>,
    %c0_i32_16 = arith.constant 0 : i32
    %52 = arith.cmpi eq, %arg1, %c0_i32_16 : i32
    %53 = arith.extui %52 : i1 to i32
    %c0_i32_17 = arith.constant 0 : i32
    %54 = arith.cmpi ne, %53, %c0_i32_17 : i32
    scf.if %54 {
      %c0_18 = arith.constant 0 : index
      %c0_19 = arith.constant 0 : index
      %55 = vector.load %arg5[%c0_18, %c0_19] : memref<1x1xf32, #tpu.memory_space<vmem>>, vector<1x1xf32>
      %c0_20 = arith.constant 0 : index
      %c0_21 = arith.constant 0 : index
      %56 = vector.load %arg4[%c0_20, %c0_21] : memref<1x1xf32, #tpu.memory_space<vmem>>, vector<1x1xf32>
      tpu.vector_store %arg4[%c0_20, %c0_21], %55 {strides = array<i32>} : memref<1x1xf32, #tpu.memory_space<vmem>>, vector<1x1xf32>,
    } else {
    }
    return
  }
  func.func @transform_0(%arg0: i32, %arg1: i32) -> (i32, i32) {
    %c1_i32 = arith.constant 1 : i32
    %0 = arith.muli %arg0, %c1_i32 : i32
    %1 = arith.addi %0, %arg1 : i32
    %c0_i32 = arith.constant 0 : i32
    %2 = arith.minsi %1, %c0_i32 : i32
    %c0_i32_0 = arith.constant 0 : i32
    %c0_i32_1 = arith.constant 0 : i32
    return %2, %c0_i32_0 : i32, i32
  }
  func.func @transform_1(%arg0: i32, %arg1: i32) -> (i32, i32) {
    %c1_i32 = arith.constant 1 : i32
    %0 = arith.muli %arg0, %c1_i32 : i32
    %1 = arith.addi %0, %arg1 : i32
    %c0_i32 = arith.constant 0 : i32
    %2 = arith.minsi %1, %c0_i32 : i32
    %c0_i32_0 = arith.constant 0 : i32
    %c0_i32_1 = arith.constant 0 : i32
    return %2, %c0_i32_0 : i32, i32
  }
  func.func @transform_2(%arg0: i32, %arg1: i32) -> (i32, i32) {
    %c0_i32 = arith.constant 0 : i32
    %c0_i32_0 = arith.constant 0 : i32
    return %arg0, %c0_i32 : i32, i32
  }
}

</mosaic_0001>

<bundles_post_ra>
// kernel: tpu_custom_call.1
= control target key start
LH: loop header
LB: loop body
LE: loop exit
PB: predicated region body
PF: predicated region fallthrough
CT: control target
= control target key end

     0   :  { %vm158_vm0 = vcmask 56320   ;;  %v1959_v3 = vmov 0   ;;  %s3264_s0 = inlined_call_operand.vmem [shape: f32[300,7], index: 0, kind: input, shape index: {}]   ;;  %s3265_s1 = inlined_call_operand.vmem [shape: s32[300,1], index: 1, kind: input, shape index: {}]   ;;  %s3266_s2 = inlined_call_operand.hbm [shape: f32[1,1], index: 2, kind: output, shape index: {}]  }
   0x1   :  { %v1980_v0 = vld [vmem:[%s3264_s0 + $0x10] sm:$0xff]  ;;  %v1985_v1 = vld [vmem:[%s3264_s0 + $0x18] sm:$0xff]  ;;  %1621 = vset.pattern.permute.xlu1 %v1959_v3  ;;  %1622 = vset.pattern.permute.xlu0 %v1959_v3  ;;  %v1992_v4 = vld [vmem:[%s3264_s0] sm:$0xff] }
   0x2   :  { %v165_v2 = vsel %vm158_vm0, %v1980_v0, -inf  ;;  %v168_v5 = vsel %vm158_vm0, %v1985_v1, -inf  ;;  %v159_v6 = vsel %vm158_vm0, %v1992_v4, -inf  ;;  %v2001_v7 = vld [vmem:[%s3264_s0 + $0x8] sm:$0xff]  ;;  %v2013_v10 = vld [vmem:[%s3264_s0 + $0x20] sm:$0xff] }
   0x3   :  { %166 = vmax.xlane.f32.xlu1 %v165_v2  ;;  %v2006_v8 = vld [vmem:[%s3264_s0 + $0x28] sm:$0xff]  ;;  %160 = vmax.xlane.f32.xlu0 %v159_v6  ;;  %v162_v9 = vsel %vm158_vm0, %v2001_v7, -inf }
   0x4   :  { %v174_v11 = vsel %vm158_vm0, %v2006_v8, -inf }
   0x7   :  { %169 = vmax.xlane.f32.xlu1 %v168_v5 }
   0x8   :  { %7 = vsyncpa [#allocation4], 0  ;;  %v2020_v12 = vld [vmem:[%s3264_s0 + $0x38] sm:$0xff]  ;;  %163 = vmax.xlane.f32.xlu0 %v162_v9  ;;  %v171_v13 = vsel %vm158_vm0, %v2013_v10, -inf  ;;  %v2027_v14 = vld [vmem:[%s3264_s0 + $0x30] sm:$0xff]  ;;  %s1961_s8 = smov [#allocation3]  }
   0x9   :  { %v180_v15 = vsel %vm158_vm0, %v2020_v12, -inf  ;;  %v2034_v16 = vld [vmem:[%s3264_s0 + $0x48] sm:$0xff]  ;;  %v177_v17 = vsel %vm158_vm0, %v2027_v14, -inf  ;;  %v2041_v18 = vld [vmem:[%s3264_s0 + $0x40] sm:$0xff]  ;;  %v2048_v20 = vld [vmem:[%s3264_s0 + $0x58] sm:$0xff]  ;;  %s1596_s9 = sshll.u32 %s1961_s8, 4  ;;  %s1597_s9 = int_to_ptr.vmem [resolvable:$true] %s1596_s9 }
   0xa   :  { %v186_v19 = vsel %vm158_vm0, %v2034_v16, -inf  ;;  %v183_v21 = vsel %vm158_vm0, %v2041_v18, -inf  ;;  %v2055_v22 = vld [vmem:[%s3264_s0 + $0x50] sm:$0xff]  ;;  %v192_v23 = vsel %vm158_vm0, %v2048_v20, -inf  ;;  %v2064_v25 = vld [vmem:[%s3264_s0 + $0x60] sm:$0xff]  ;;  %v2161_v53 = vld [vmem:[%s3264_s0 + $0x68] sm:$0xff]  ;;  %p1940_p1 = scmp.lt.s32.totalorder %s1597_s9, %s1597_s9 }
   0xb   :  { %175 = vmax.xlane.f32.xlu1 %v174_v11  ;;  %v189_v24 = vsel %vm158_vm0, %v2055_v22, -inf  ;;  %v195_v26 = vsel %vm158_vm0, %v2064_v25, -inf  ;;  %v2071_v27 = vld [vmem:[%s3264_s0 + $0x70] sm:$0xff]  ;;  %v2078_v29 = vld [vmem:[%s3264_s0 + $0x80] sm:$0xff]  ;;  %v2166_v54 = vld [vmem:[%s3264_s0 + $0x78] sm:$0xff]  ;;  %v198_v55 = vsel %vm158_vm0, %v2161_v53, -inf  ;;  %v3267_v11 = vlaneseq }
   0xc   :  { %172 = vmax.xlane.f32.xlu0 %v171_v13  ;;  %v201_v28 = vsel %vm158_vm0, %v2071_v27, -inf  ;;  %v207_v30 = vsel %vm158_vm0, %v2078_v29, -inf  ;;  %v2085_v31 = vld [vmem:[%s3264_s0 + $0x90] sm:$0xff]  ;;  %v120_v32 = vld [vmem:[%s3265_s1] sm:$0xff]  ;;  %v204_v57 = vsel %vm158_vm0, %v2166_v54, -inf  ;;  %v2177_v58 = vld [vmem:[%s3264_s0 + $0x88] sm:$0xff] }
   0xd   :  { %v213_v33 = vsel %vm158_vm0, %v2085_v31, -inf  ;;  %v2095_v34 = vld [vmem:[%s3264_s0 + $0xa0] sm:$0xff]  ;;  %v122_v35 = vld [vmem:[%s3265_s1 + $0x10] sm:$0xff]  ;;  %v210_v60 = vsel %vm158_vm0, %v2177_v58, -inf  ;;  %v2186_v61 = vld [vmem:[%s3264_s0 + $0x98] sm:$0xff]  ;;  %s1935_s10 = scalar_lea.vmem %s1597_s9, 16 }
   0xe   :  { %v219_v36 = vsel %vm158_vm0, %v2095_v34, -inf  ;;  %v2105_v37 = vld [vmem:[%s3264_s0 + $0xb0] sm:$0xff]  ;;  %v2112_v39 = vld [vmem:[%s3264_s0 + $0xc0] sm:$0xff]  ;;  %v216_v63 = vsel %vm158_vm0, %v2186_v61, -inf  ;;  %v2195_v2 = vld [vmem:[%s3264_s0 + $0xa8] sm:$0xff]  ;;  %p1936_p0 = scmp.ne.s32.totalorder %s1597_s9, %s1935_s10  ;;  %s1939_s11 = scalar_lea.vmem %s1597_s9, 32 }
   0xf   :  { %181 = vmax.xlane.f32.xlu1 %v180_v15  ;;  %v225_v38 = vsel %vm158_vm0, %v2105_v37, -inf  ;;  %v231_v40 = vsel %vm158_vm0, %v2112_v39, -inf  ;;  %v2119_v41 = vld [vmem:[%s3264_s0 + $0xd0] sm:$0xff]  ;;  %v2126_v43 = vld [vmem:[%s3264_s0 + $0xe0] sm:$0xff]  ;;  %v222_v5 = vsel %vm158_vm0, %v2195_v2, -inf  ;;  %v2204_v6 = vld [vmem:[%s3264_s0 + $0xb8] sm:$0xff]  ;;  %p1941_p2 = scmp.lt.s32.totalorder %s1939_s11, %s1935_s10 }
  0x10   :  { %178 = vmax.xlane.f32.xlu0 %v177_v17  ;;  %v237_v42 = vsel %vm158_vm0, %v2119_v41, -inf  ;;  %3319 = vst [vmem:[#allocation6_spill] sm:$0xff] %v2126_v43  ;;  %v243_v44 = vsel %vm158_vm0, %v2126_v43, -inf  ;;  %v2133_v45 = vld [vmem:[%s3264_s0 + $0xf0] sm:$0xff]  ;;  %v2140_v47 = vld [vmem:[%s3264_s0 + $0x100] sm:$0xff]  ;;  %v228_v13 = vsel %vm158_vm0, %v2204_v6, -inf }
  0x11   :  { %3320 = vst [vmem:[#allocation7_spill] sm:$0xff] %v2133_v45  ;;  %v249_v46 = vsel %vm158_vm0, %v2133_v45, -inf  ;;  %3321 = vst [vmem:[#allocation8_spill] sm:$0xff] %v2140_v47  ;;  %v255_v48 = vsel %vm158_vm0, %v2140_v47, -inf  ;;  %v2147_v49 = vld [vmem:[%s3264_s0 + $0x110] sm:$0xff]  ;;  %v2154_v51 = vld [vmem:[%s3264_s0 + $0x120] sm:$0xff]  ;;  %p1942_p3 = por %p1941_p2, %p1940_p1 }
  0x12   :  { %3322 = vst [vmem:[#allocation9_spill] sm:$0xff] %v2147_v49  ;;  %v261_v50 = vsel %vm158_vm0, %v2147_v49, -inf  ;;  %3323 = vst [vmem:[#allocation10_spill] sm:$0xff] %v2154_v51  ;;  %v267_v52 = vsel %vm158_vm0, %v2154_v51, -inf  ;;  %v2213_v15 = vld [vmem:[%s3264_s0 + $0xc8] sm:$0xff] }
  0x13   :  { %187 = vmax.xlane.f32.xlu1 %v186_v19  ;;  %v2218_v19 = vand.u32 127, %v3267_v11  ;;  %p1943_p4 = pnand %p1942_p3, %p1936_p0 }
  0x14   :  { %184 = vmax.xlane.f32.xlu0 %v183_v21  ;;  %v234_v21 = vsel %vm158_vm0, %v2213_v15, -inf }
  0x17   :  { %193 = vmax.xlane.f32.xlu1 %v192_v23  ;;  %v2225_v23 = vld [vmem:[%s3264_s0 + $0xd8] sm:$0xff] }
  0x18   :  { %190 = vmax.xlane.f32.xlu0 %v189_v24 }
  0x1c   :  { %196 = vmax.xlane.f32.xlu0 %v195_v26  ;;  %v240_v26 = vsel %vm158_vm0, %v2225_v23, -inf }
  0x20   :  { %202 = vmax.xlane.f32.xlu0 %v201_v28 }
  0x24   :  { %208 = vmax.xlane.f32.xlu0 %v207_v30 }
  0x28   :  { %618 = vperm.xlu1 %1621, %v120_v32   ;;  %214 = vmax.xlane.f32.xlu0 %v213_v33  ;;  %v2235_v32 = vld [vmem:[%s3264_s0 + $0xe8] sm:$0xff] }
  0x29   :  { %3326 = vst [vmem:[#allocation13_spill] sm:$0xff] %v2235_v32  ;;  %v246_v33 = vsel %vm158_vm0, %v2235_v32, -inf }
  0x2c   :  { %624 = vperm.xlu1 %1621, %v122_v35   ;;  %220 = vmax.xlane.f32.xlu0 %v219_v36  ;;  %v2242_v35 = vld [vmem:[%s3264_s0 + $0xf8] sm:$0xff] }
  0x2d   :  { %3327 = vst [vmem:[#allocation14_spill] sm:$0xff] %v2242_v35  ;;  %v252_v36 = vsel %vm158_vm0, %v2242_v35, -inf }
  0x30   :  { %226 = vmax.xlane.f32.xlu0 %v225_v38  ;;  %v2249_v38 = vld [vmem:[%s3264_s0 + $0x108] sm:$0xff] }
  0x31   :  { %3328 = vst [vmem:[#allocation15_spill] sm:$0xff] %v2249_v38 }
  0x34   :  { %232 = vmax.xlane.f32.xlu0 %v231_v40  ;;  %v258_v40 = vsel %vm158_vm0, %v2249_v38, -inf }
  0x38   :  { %238 = vmax.xlane.f32.xlu0 %v237_v42  ;;  %v2256_v42 = vld [vmem:[%s3264_s0 + $0x118] sm:$0xff] }
  0x39   :  { %3329 = vst [vmem:[#allocation16_spill] sm:$0xff] %v2256_v42 }
  0x3c   :  { %244 = vmax.xlane.f32.xlu0 %v243_v44  ;;  %v264_v44 = vsel %vm158_vm0, %v2256_v42, -inf }
  0x40   :  { %250 = vmax.xlane.f32.xlu0 %v249_v46  ;;  %v2263_v46 = vld [vmem:[%s3264_s0 + $0x128] sm:$0xff] }
  0x41   :  { %3330 = vst [vmem:[#allocation17_spill] sm:$0xff] %v2263_v46 }
  0x44   :  { %256 = vmax.xlane.f32.xlu0 %v255_v48  ;;  %v121_v48 = vld [vmem:[%s3265_s1 + $0x8] sm:$0xff] }
  0x48   :  { %262 = vmax.xlane.f32.xlu0 %v261_v50  ;;  %v270_v50 = vsel %vm158_vm0, %v2263_v46, -inf }
  0x4c   :  { %268 = vmax.xlane.f32.xlu0 %v267_v52  ;;  %v125_v52 = vld [vmem:[%s3265_s1 + $0x28] sm:$0xff] }
  0x50   :  { %199 = vmax.xlane.f32.xlu1 %v198_v55  ;;  %v127_v55 = vld [vmem:[%s3265_s1 + $0x38] sm:$0xff] }
  0x54   :  { %205 = vmax.xlane.f32.xlu1 %v204_v57  ;;  %v129_v57 = vld [vmem:[%s3265_s1 + $0x48] sm:$0xff] }
  0x58   :  { %211 = vmax.xlane.f32.xlu1 %v210_v60 }
  0x5c   :  { %217 = vmax.xlane.f32.xlu1 %v216_v63  ;;  %v131_v63 = vld [vmem:[%s3265_s1 + $0x58] sm:$0xff] }
  0x60   :  { %223 = vmax.xlane.f32.xlu1 %v222_v5 }
  0x64   :  { %229 = vmax.xlane.f32.xlu1 %v228_v13  ;;  %v133_v13 = vld [vmem:[%s3265_s1 + $0x68] sm:$0xff] }
  0x68   :  { %235 = vmax.xlane.f32.xlu1 %v234_v21  ;;  %v135_v21 = vld [vmem:[%s3265_s1 + $0x78] sm:$0xff] }
  0x6c   :  { %241 = vmax.xlane.f32.xlu1 %v240_v26  ;;  %v137_v26 = vld [vmem:[%s3265_s1 + $0x88] sm:$0xff] }
  0x70   :  { %247 = vmax.xlane.f32.xlu1 %v246_v33  ;;  %v141_v33 = vld [vmem:[%s3265_s1 + $0xa8] sm:$0xff] }
  0x74   :  { %253 = vmax.xlane.f32.xlu1 %v252_v36 }
  0x78   :  { %259 = vmax.xlane.f32.xlu1 %v258_v40  ;;  %v143_v40 = vld [vmem:[%s3265_s1 + $0xb8] sm:$0xff] }
  0x7c   :  { %265 = vmax.xlane.f32.xlu1 %v264_v44 }
  0x80   :  { %271 = vmax.xlane.f32.xlu1 %v270_v50  ;;  %v147_v50 = vld [vmem:[%s3265_s1 + $0xd8] sm:$0xff] }
  0x90   :  { %v2170_v56 = vpop.xlane.xlu1 %166  ;;  %v2279_v60 = vpop.xlane.xlu0 %160 }
  0x91   :  { %3331 = vst [vmem:[#allocation18_spill] sm:$0xff] %v2279_v60 }
  0x94   :  { %v2179_v59 = vpop.xlane.xlu1 %169 }
  0x95   :  { %v2284_v5 = vpop.xlane.xlu0 %163 }
  0x96   :  { %3332 = vst [vmem:[#allocation19_spill] sm:$0xff] %v2284_v5 }
  0x98   :  { %v2188_v62 = vpop.xlane.xlu1 %175 }
  0x9c   :  { %v2197_v3 = vpop.xlane.xlu1 %181 }
  0x9d   :  { %3324 = vst [vmem:[#allocation11_spill] sm:$0xff] %v2197_v3 }
  0xa0   :  { %v2206_v9 = vpop.xlane.xlu1 %187 }
  0xa1   :  { %3325 = vst [vmem:[#allocation12_spill] sm:$0xff] %v2206_v9 }
  0xa4   :  { %v2215_v17 = vpop.xlane.xlu1 %193 }
  0xa8   :  { %v619_v24 = vpop.permute.xlu1 %618 }
  0xa9   :  { %vm731_vm1 = vcmp.eq.s32.totalorder %v2218_v19, %v619_v24  ;;  %v2292_v24 = vpop.xlane.xlu0 %172 }
  0xaa   :  { %v769_v28 = vsel %vm731_vm1, %v1992_v4, 0.0  ;;  %3333 = vst [vmem:[#allocation20_spill] sm:$0xff] %v2292_v24 }
  0xab   :  { %v807_v30 = vsel %vm158_vm0, %v769_v28, 0.0 }
  0xac   :  { %808 = vadd.xlane.f32.xlu0 %v807_v30  ;;  %v139_v30 = vld [vmem:[%s3265_s1 + $0x98] sm:$0xff] }
  0xad   :  { %v2297_v28 = vpop.xlane.xlu0 %178 }
  0xae   :  { %3334 = vst [vmem:[#allocation21_spill] sm:$0xff] %v2297_v28  ;;  %v279_v32 = vsub.f32 %v2027_v14, %v2297_v28 }
  0xb1   :  { %v2305_v36 = vpop.xlane.xlu0 %184 }
  0xb2   :  { %3335 = vst [vmem:[#allocation22_spill] sm:$0xff] %v2305_v36 }
  0xb5   :  { %v2310_v44 = vpop.xlane.xlu0 %190 }
  0xb6   :  { %3336 = vst [vmem:[#allocation23_spill] sm:$0xff] %v2310_v44 }
  0xc2   :  { %621 = vperm.xlu0 %1622, %v121_v48   ;;  %v145_v48 = vld [vmem:[%s3265_s1 + $0xc8] sm:$0xff] }
  0xc6   :  { %633 = vperm.xlu0 %1622, %v125_v52   ;;  %v2318_v52 = vpop.xlane.xlu0 %196 }
  0xc7   :  { %3337 = vst [vmem:[#allocation24_spill] sm:$0xff] %v2318_v52 }
  0xca   :  { %639 = vperm.xlu0 %1622, %v127_v55   ;;  %v149_v55 = vld [vmem:[%s3265_s1 + $0xe8] sm:$0xff] }
  0xce   :  { %645 = vperm.xlu0 %1622, %v129_v57   ;;  %v2323_v57 = vpop.xlane.xlu0 %202 }
  0xcf   :  { %3338 = vst [vmem:[#allocation25_spill] sm:$0xff] %v2323_v57 }
  0xd2   :  { %651 = vperm.xlu0 %1622, %v131_v63   ;;  %v150_v63 = vld [vmem:[%s3265_s1 + $0xf0] sm:$0xff] }
  0xd6   :  { %657 = vperm.xlu0 %1622, %v133_v13   ;;  %v151_v13 = vld [vmem:[%s3265_s1 + $0xf8] sm:$0xff] }
  0xda   :  { %663 = vperm.xlu0 %1622, %v135_v21   ;;  %v2331_v21 = vpop.xlane.xlu0 %208 }
  0xdb   :  { %3339 = vst [vmem:[#allocation26_spill] sm:$0xff] %v2331_v21 }
  0xde   :  { %669 = vperm.xlu0 %1622, %v137_v26   ;;  %v152_v26 = vld [vmem:[%s3265_s1 + $0x100] sm:$0xff] }
  0xe2   :  { %675 = vperm.xlu0 %1622, %v139_v30   ;;  %v2336_v30 = vpop.xlane.xlu0 %214 }
  0xe6   :  { %681 = vperm.xlu0 %1622, %v141_v33   ;;  %v153_v33 = vld [vmem:[%s3265_s1 + $0x108] sm:$0xff] }
  0xea   :  { %687 = vperm.xlu0 %1622, %v143_v40   ;;  %v155_v40 = vld [vmem:[%s3265_s1 + $0x118] sm:$0xff] }
  0xee   :  { %693 = vperm.xlu0 %1622, %v145_v48   ;;  %v2344_v48 = vpop.xlane.xlu0 %220 }
  0xf2   :  { %699 = vperm.xlu0 %1622, %v147_v50   ;;  %v156_v50 = vld [vmem:[%s3265_s1 + $0x120] sm:$0xff] }
  0xf6   :  { %705 = vperm.xlu0 %1622, %v149_v55   ;;  %v2349_v55 = vpop.xlane.xlu0 %226 }
  0xfa   :  { %708 = vperm.xlu0 %1622, %v150_v63   ;;  %v2351_v63 = vpop.xlane.xlu0 %232 }
  0xfe   :  { %711 = vperm.xlu0 %1622, %v151_v13   ;;  %v273_v13 = vsub.f32 %v1992_v4, %v2279_v60  ;;  %v625_v4 = vpop.permute.xlu1 %624 }
  0xff   :  { %vm733_vm2 = vcmp.eq.s32.totalorder %v2218_v19, %v625_v4  ;;  %v124_v4 = vld [vmem:[%s3265_s1 + $0x20] sm:$0xff] }
 0x102   :  { %714 = vperm.xlu0 %1622, %v152_v26   ;;  %v2355_v26 = vpop.xlane.xlu0 %238 }
 0x106   :  { %717 = vperm.xlu0 %1622, %v153_v33   ;;  %v311_v33 = vmul.f32 1.442695, %v273_v13  ;;  %v2357_v11 = vpop.xlane.xlu0 %244 }
 0x108   :  { %1623 = vpow2.f32 %v311_v33 }
 0x10a   :  { %723 = vperm.xlu0 %1622, %v155_v40   ;;  %v2359_v42 = vpop.xlane.xlu0 %250 }
 0x10b   :  { %3340 = vst [vmem:[#allocation27_spill] sm:$0xff] %v2359_v42 }
 0x10e   :  { %726 = vperm.xlu0 %1622, %v156_v50   ;;  %v2361_v46 = vpop.xlane.xlu0 %256 }
 0x10f   :  { %3341 = vst [vmem:[#allocation28_spill] sm:$0xff] %v2361_v46  ;;  %v277_v46 = vsub.f32 %v2013_v10, %v2292_v24 }
 0x112   :  { %v1624_v40 = vpop.eup %1623  ;;  %v2364_v50 = vpop.xlane.xlu0 %262 }
 0x113   :  { %v387_v51 = vsel %vm158_vm0, %v1624_v40, 0.0  ;;  %3342 = vst [vmem:[#allocation29_spill] sm:$0xff] %v2364_v50  ;;  %v771_v40 = vsel %vm733_vm2, %v1980_v0, 0.0 }
 0x116   :  { %v2366_v49 = vpop.xlane.xlu0 %268 }
 0x117   :  { %3343 = vst [vmem:[#allocation30_spill] sm:$0xff] %v2366_v49 }
 0x12d   :  { %388 = vadd.xlane.f32.xlu0 %v387_v51  ;;  %v813_v51 = vsel %vm158_vm0, %v771_v40, 0.0  ;;  %v134_v40 = vld [vmem:[%s3265_s1 + $0x70] sm:$0xff] }
 0x139   :  { %v2368_v38 = vpop.xlane.xlu0 %808 }
 0x13a   :  { %3344 = vst [vmem:[#allocation31_spill] sm:$0xff] %v2368_v38  ;;  %v123_v38 = vld [vmem:[%s3265_s1 + $0x18] sm:$0xff] }
 0x141   :  { %v622_v60 = vpop.permute.xlu0 %621 }
 0x142   :  { %vm732_vm3 = vcmp.eq.s32.totalorder %v2218_v19, %v622_v60  ;;  %v126_v60 = vld [vmem:[%s3265_s1 + $0x30] sm:$0xff] }
 0x143   :  { %v770_v13 = vsel %vm732_vm3, %v2001_v7, 0.0 }
 0x144   :  { %v810_v33 = vsel %vm158_vm0, %v770_v13, 0.0  ;;  %v128_v13 = vld [vmem:[%s3265_s1 + $0x40] sm:$0xff] }
 0x145   :  { %811 = vadd.xlane.f32.xlu1 %v810_v33  ;;  %v130_v33 = vld [vmem:[%s3265_s1 + $0x50] sm:$0xff] }
 0x149   :  { %814 = vadd.xlane.f32.xlu1 %v813_v51  ;;  %v136_v51 = vld [vmem:[%s3265_s1 + $0x80] sm:$0xff] }
 0x15a   :  { %627 = vperm.xlu1 %1621, %v123_v38   ;;  %v132_v38 = vld [vmem:[%s3265_s1 + $0x60] sm:$0xff] }
 0x15e   :  { %630 = vperm.xlu1 %1621, %v124_v4   ;;  %v138_v4 = vld [vmem:[%s3265_s1 + $0x90] sm:$0xff] }
 0x162   :  { %636 = vperm.xlu1 %1621, %v126_v60   ;;  %v140_v60 = vld [vmem:[%s3265_s1 + $0xa0] sm:$0xff] }
 0x166   :  { %642 = vperm.xlu1 %1621, %v128_v13   ;;  %v142_v13 = vld [vmem:[%s3265_s1 + $0xb0] sm:$0xff] }
 0x16a   :  { %648 = vperm.xlu1 %1621, %v130_v33   ;;  %v144_v33 = vld [vmem:[%s3265_s1 + $0xc0] sm:$0xff] }
 0x16e   :  { %654 = vperm.xlu1 %1621, %v132_v38   ;;  %v2412_v38 = vpop.xlane.xlu1 %199 }
 0x16f   :  { %3345 = vst [vmem:[#allocation32_spill] sm:$0xff] %v2412_v38 }
 0x172   :  { %660 = vperm.xlu1 %1621, %v134_v40   ;;  %v146_v40 = vld [vmem:[%s3265_s1 + $0xd0] sm:$0xff] }
 0x176   :  { %666 = vperm.xlu1 %1621, %v136_v51   ;;  %v2417_v51 = vpop.xlane.xlu1 %205 }
 0x17a   :  { %672 = vperm.xlu1 %1621, %v138_v4   ;;  %v148_v4 = vld [vmem:[%s3265_s1 + $0xe0] sm:$0xff] }
 0x17e   :  { %678 = vperm.xlu1 %1621, %v140_v60   ;;  %v154_v60 = vld [vmem:[%s3265_s1 + $0x110] sm:$0xff] }
 0x182   :  { %684 = vperm.xlu1 %1621, %v142_v13   ;;  %v2425_v13 = vpop.xlane.xlu1 %211 }
 0x186   :  { %690 = vperm.xlu1 %1621, %v144_v33   ;;  %v157_v33 = vld [vmem:[%s3265_s1 + $0x128] sm:$0xff] }
 0x18a   :  { %696 = vperm.xlu1 %1621, %v146_v40   ;;  %v2430_v40 = vpop.xlane.xlu1 %217 }
 0x18e   :  { %702 = vperm.xlu1 %1621, %v148_v4   ;;  %v2432_v49 = vpop.xlane.xlu1 %223  ;;  %v274_v4 = vsub.f32 %v2001_v7, %v2284_v5  ;;  %v280_v7 = vsub.f32 %v2020_v12, %v2197_v3 }
 0x190   :  { %v313_v47 = vmul.f32 1.442695, %v274_v4  ;;  %v323_v4 = vmul.f32 1.442695, %v279_v32  ;;  %v325_v43 = vmul.f32 1.442695, %v280_v7 }
 0x192   :  { %720 = vperm.xlu1 %1621, %v154_v60   ;;  %v2434_v50 = vpop.xlane.xlu1 %229  ;;  %v278_v60 = vsub.f32 %v2006_v8, %v2188_v62  ;;  %1625 = vpow2.f32 %v313_v47  ;;  %v281_v47 = vsub.f32 %v2041_v18, %v2305_v36 }
 0x194   :  { %v321_v42 = vmul.f32 1.442695, %v278_v60  ;;  %v327_v3 = vmul.f32 1.442695, %v281_v47 }
 0x196   :  { %729 = vperm.xlu1 %1621, %v157_v33   ;;  %v2440_v35 = vpop.xlane.xlu1 %235  ;;  %v319_v33 = vmul.f32 1.442695, %v277_v46 }
 0x198   :  { %1627 = vpow2.f32 %v319_v33 }
 0x199   :  { %1629 = vpow2.f32 %v321_v42  ;;  %v282_v42 = vsub.f32 %v2034_v16, %v2206_v9 }
 0x19a   :  { %v2444_v45 = vpop.xlane.xlu1 %241  ;;  %1631 = vpow2.f32 %v323_v4  ;;  %v283_v4 = vsub.f32 %v2055_v22, %v2310_v44 }
 0x19b   :  { %1633 = vpow2.f32 %v325_v43  ;;  %v329_v7 = vmul.f32 1.442695, %v282_v42  ;;  %v284_v43 = vsub.f32 %v2048_v20, %v2215_v17 }
 0x19c   :  { %v1626_v5 = vpop.eup %1625  ;;  %1635 = vpow2.f32 %v327_v3  ;;  %v331_v47 = vmul.f32 1.442695, %v283_v4 }
 0x19d   :  { %v390_v46 = vsel %vm158_vm0, %v1626_v5, 0.0  ;;  %1637 = vpow2.f32 %v329_v7  ;;  %v333_v3 = vmul.f32 1.442695, %v284_v43  ;;  %v275_v7 = vsub.f32 %v1980_v0, %v2170_v56 }
 0x19e   :  { %v2450_v24 = vpop.xlane.xlu1 %247  ;;  %1639 = vpow2.f32 %v331_v47 }
 0x19f   :  { %1641 = vpow2.f32 %v333_v3 }
 0x1a2   :  { %v1628_v60 = vpop.eup %1627  ;;  %v2455_v33 = vpop.xlane.xlu1 %253 }
 0x1a3   :  { %3346 = vst [vmem:[#allocation33_spill] sm:$0xff] %v2455_v33  ;;  %v399_v32 = vsel %vm158_vm0, %v1628_v60, 0.0  ;;  %v1630_v28 = vpop.eup %1629 }
 0x1a4   :  { %v402_v5 = vsel %vm158_vm0, %v1630_v28, 0.0 }
 0x1a6   :  { %v2462_v36 = vpop.xlane.xlu1 %259 }
 0x1a7   :  { %3347 = vst [vmem:[#allocation34_spill] sm:$0xff] %v2462_v36 }
 0x1aa   :  { %v2468_v42 = vpop.xlane.xlu1 %265 }
 0x1ab   :  { %3348 = vst [vmem:[#allocation35_spill] sm:$0xff] %v2468_v42 }
 0x1ba   :  { %391 = vadd.xlane.f32.xlu1 %v390_v46  ;;  %v1632_v46 = vpop.eup %1631 }
 0x1bb   :  { %v405_v60 = vsel %vm158_vm0, %v1632_v46, 0.0  ;;  %v1634_v9 = vpop.eup %1633  ;;  %v2477_v46 = vpop.xlane.xlu1 %271 }
 0x1bc   :  { %v408_v28 = vsel %vm158_vm0, %v1634_v9, 0.0  ;;  %v1636_v44 = vpop.eup %1635  ;;  %3349 = vst [vmem:[#allocation36_spill] sm:$0xff] %v2477_v46  ;;  %v287_v9 = vsub.f32 %v2071_v27, %v2323_v57 }
 0x1bd   :  { %v411_v43 = vsel %vm158_vm0, %v1636_v44, 0.0  ;;  %v1638_v47 = vpop.eup %1637  ;;  %v288_v44 = vsub.f32 %v2166_v54, %v2417_v51 }
 0x1be   :  { %400 = vadd.xlane.f32.xlu1 %v399_v32  ;;  %v285_v32 = vsub.f32 %v2064_v25, %v2318_v52  ;;  %v414_v52 = vsel %vm158_vm0, %v1638_v47, 0.0  ;;  %v1640_v0 = vpop.eup %1639 }
 0x1bf   :  { %v341_v47 = vmul.f32 1.442695, %v288_v44 }
 0x1c0   :  { %v335_v4 = vmul.f32 1.442695, %v285_v32  ;;  %v276_v32 = vsub.f32 %v1985_v1, %v2179_v59 }
 0x1c2   :  { %403 = vadd.xlane.f32.xlu1 %v402_v5  ;;  %v286_v5 = vsub.f32 %v2161_v53, %v2412_v38  ;;  %1643 = vpow2.f32 %v335_v4  ;;  %v339_v38 = vmul.f32 1.442695, %v287_v9  ;;  %v1642_v4 = vpop.eup %1641 }
 0x1c6   :  { %406 = vadd.xlane.f32.xlu1 %v405_v60  ;;  %v315_v60 = vmul.f32 1.442695, %v275_v7  ;;  %v417_v7 = vsel %vm158_vm0, %v1640_v0, 0.0  ;;  %v290_v0 = vsub.f32 %v2177_v58, %v2425_v13 }
 0x1c8   :  { %1645 = vpow2.f32 %v315_v60  ;;  %v420_v60 = vsel %vm158_vm0, %v1642_v4, 0.0 }
 0x1ca   :  { %409 = vadd.xlane.f32.xlu1 %v408_v28  ;;  %v337_v28 = vmul.f32 1.442695, %v286_v5 }
 0x1cc   :  { %1647 = vpow2.f32 %v337_v28  ;;  %v1644_v57 = vpop.eup %1643 }
 0x1cd   :  { %1649 = vpow2.f32 %v339_v38 }
 0x1ce   :  { %412 = vadd.xlane.f32.xlu1 %v411_v43  ;;  %v317_v43 = vmul.f32 1.442695, %v276_v32 }
 0x1d0   :  { %1651 = vpow2.f32 %v317_v43  ;;  %v291_v43 = vsub.f32 %v2085_v31, %v2336_v30 }
 0x1d1   :  { %1653 = vpow2.f32 %v341_v47 }
 0x1d2   :  { %415 = vadd.xlane.f32.xlu1 %v414_v52  ;;  %v2483_v3 = vpop.xlane.xlu1 %811  ;;  %v289_v52 = vsub.f32 %v2078_v29, %v2331_v21  ;;  %v1646_v38 = vpop.eup %1645 }
 0x1d4   :  { %v343_v28 = vmul.f32 1.442695, %v289_v52  ;;  %v345_v52 = vmul.f32 1.442695, %v290_v0 }
 0x1d6   :  { %418 = vadd.xlane.f32.xlu1 %v417_v7  ;;  %v2490_v5 = vpop.xlane.xlu1 %814  ;;  %v423_v7 = vsel %vm158_vm0, %v1644_v57, 0.0  ;;  %v1648_v21 = vpop.eup %1647  ;;  %1655 = vpow2.f32 %v343_v28  ;;  %v292_v28 = vsub.f32 %v2186_v61, %v2430_v40 }
 0x1d7   :  { %v426_v47 = vsel %vm158_vm0, %v1648_v21, 0.0  ;;  %1657 = vpow2.f32 %v345_v52 }
 0x1da   :  { %421 = vadd.xlane.f32.xlu1 %v420_v60  ;;  %v628_v9 = vpop.permute.xlu1 %627  ;;  %v1650_v60 = vpop.eup %1649 }
 0x1db   :  { %vm734_vm4 = vcmp.eq.s32.totalorder %v2218_v19, %v628_v9 }
 0x1dc   :  { %v772_v32 = vsel %vm734_vm4, %v1985_v1, 0.0  ;;  %v393_v1 = vsel %vm158_vm0, %v1646_v38, 0.0  ;;  %v349_v38 = vmul.f32 1.442695, %v292_v28 }
 0x1dd   :  { %v816_v44 = vsel %vm158_vm0, %v772_v32, 0.0  ;;  %v347_v32 = vmul.f32 1.442695, %v291_v43 }
 0x1de   :  { %424 = vadd.xlane.f32.xlu1 %v423_v7  ;;  %817 = vadd.xlane.f32.xlu0 %v816_v44  ;;  %v631_v4 = vpop.permute.xlu1 %630  ;;  %v634_v7 = vpop.permute.xlu0 %633 }
 0x1df   :  { %vm735_vm5 = vcmp.eq.s32.totalorder %v2218_v19, %v631_v4  ;;  %v1652_v44 = vpop.eup %1651  ;;  %v429_v4 = vsel %vm158_vm0, %v1650_v60, 0.0  ;;  %vm736_vm6 = vcmp.eq.s32.totalorder %v2218_v19, %v634_v7  ;;  %1659 = vpow2.f32 %v347_v32 }
 0x1e0   :  { %v773_v9 = vsel %vm735_vm5, %v2013_v10, 0.0  ;;  %v1654_v21 = vpop.eup %1653  ;;  %v293_v10 = vsub.f32 %v2095_v34, %v2344_v48  ;;  %v774_v60 = vsel %vm736_vm6, %v2006_v8, 0.0  ;;  %1661 = vpow2.f32 %v349_v38 }
 0x1e1   :  { %v819_v0 = vsel %vm158_vm0, %v773_v9, 0.0  ;;  %v432_v52 = vsel %vm158_vm0, %v1654_v21, 0.0  ;;  %v294_v32 = vsub.f32 %v2195_v2, %v2432_v49  ;;  %v822_v28 = vsel %vm158_vm0, %v774_v60, 0.0 }
 0x1e2   :  { %427 = vadd.xlane.f32.xlu1 %v426_v47  ;;  %394 = vadd.xlane.f32.xlu0 %v393_v1  ;;  %v637_v57 = vpop.permute.xlu1 %636  ;;  %v396_v47 = vsel %vm158_vm0, %v1652_v44, 0.0  ;;  %v1656_v1 = vpop.eup %1655  ;;  %v351_v9 = vmul.f32 1.442695, %v293_v10  ;;  %v295_v8 = vsub.f32 %v2105_v37, %v2349_v55  ;;  %v296_v60 = vsub.f32 %v2204_v6, %v2434_v50 }
 0x1e3   :  { %vm737_vm7 = vcmp.eq.s32.totalorder %v2218_v19, %v637_v57  ;;  %v435_v7 = vsel %vm158_vm0, %v1656_v1, 0.0  ;;  %v353_v57 = vmul.f32 1.442695, %v294_v32 }
 0x1e4   :  { %v775_v44 = vsel %vm737_vm7, %v2027_v14, 0.0  ;;  %1663 = vpow2.f32 %v351_v9  ;;  %v355_v1 = vmul.f32 1.442695, %v295_v8 }
 0x1e5   :  { %v825_v38 = vsel %vm158_vm0, %v775_v44, 0.0  ;;  %1665 = vpow2.f32 %v353_v57 }
 0x1e6   :  { %430 = vadd.xlane.f32.xlu1 %v429_v4  ;;  %820 = vadd.xlane.f32.xlu0 %v819_v0  ;;  %v643_v43 = vpop.permute.xlu1 %642  ;;  %v640_v4 = vpop.permute.xlu0 %639  ;;  %1667 = vpow2.f32 %v355_v1 }
 0x1e7   :  { %v1658_v0 = vpop.eup %1657  ;;  %vm738_vm8 = vcmp.eq.s32.totalorder %v2218_v19, %v640_v4  ;;  %vm739_vm9 = vcmp.eq.s32.totalorder %v2218_v19, %v643_v43  ;;  %v357_v43 = vmul.f32 1.442695, %v296_v60 }
 0x1e8   :  { %v438_v10 = vsel %vm158_vm0, %v1658_v0, 0.0 }
 0x1e9   :  { %1669 = vpow2.f32 %v357_v43  ;;  %v300_v43 = vsub.f32 %v2225_v23, %v2444_v45 }
 0x1ea   :  { %433 = vadd.xlane.f32.xlu1 %v432_v52  ;;  %397 = vadd.xlane.f32.xlu0 %v396_v47  ;;  %v649_v21 = vpop.permute.xlu1 %648  ;;  %v1660_v52 = vpop.eup %1659  ;;  %v776_v47 = vsel %vm738_vm8, %v2020_v12, 0.0  ;;  %v297_v12 = vsub.f32 %v2112_v39, %v2351_v63 }
 0x1eb   :  { %v646_v14 = vpop.permute.xlu0 %645  ;;  %v441_v4 = vsel %vm158_vm0, %v1660_v52, 0.0  ;;  %v828_v32 = vsel %vm158_vm0, %v776_v47, 0.0  ;;  %vm741_vm11 = vcmp.eq.s32.totalorder %v2218_v19, %v649_v21  ;;  %v298_v52 = vsub.f32 %v2213_v15, %v2440_v35 }
 0x1ec   :  { %vm740_vm10 = vcmp.eq.s32.totalorder %v2218_v19, %v646_v14  ;;  %v779_v14 = vsel %vm741_vm11, %v2055_v22, 0.0 }
 0x1ed   :  { %v361_v21 = vmul.f32 1.442695, %v298_v52 }
 0x1ee   :  { %436 = vadd.xlane.f32.xlu1 %v435_v7  ;;  %823 = vadd.xlane.f32.xlu0 %v822_v28  ;;  %v655_v9 = vpop.permute.xlu1 %654  ;;  %v1662_v7 = vpop.eup %1661  ;;  %v777_v28 = vsel %vm739_vm9, %v2041_v18, 0.0  ;;  %v359_v18 = vmul.f32 1.442695, %v297_v12 }
 0x1ef   :  { %v444_v0 = vsel %vm158_vm0, %v1662_v7, 0.0  ;;  %v831_v44 = vsel %vm158_vm0, %v777_v28, 0.0  ;;  %v1664_v8 = vpop.eup %1663  ;;  %vm743_vm13 = vcmp.eq.s32.totalorder %v2218_v19, %v655_v9 }
 0x1f0   :  { %v447_v39 = vsel %vm158_vm0, %v1664_v8, 0.0  ;;  %v1666_v1 = vpop.eup %1665  ;;  %1671 = vpow2.f32 %v359_v18  ;;  %v781_v8 = vsel %vm743_vm13, %v2064_v25, 0.0  ;;  %v365_v18 = vmul.f32 1.442695, %v300_v43 }
 0x1f1   :  { %v1668_v7 = vpop.eup %1667  ;;  %1673 = vpow2.f32 %v361_v21  ;;  %v843_v52 = vsel %vm158_vm0, %v781_v8, 0.0 }
 0x1f2   :  { %439 = vadd.xlane.f32.xlu1 %v438_v10  ;;  %826 = vadd.xlane.f32.xlu0 %v825_v38  ;;  %v661_v57 = vpop.permute.xlu1 %660  ;;  %v778_v10 = vsel %vm740_vm10, %v2034_v16, 0.0  ;;  %v652_v38 = vpop.permute.xlu0 %651  ;;  %v299_v16 = vsub.f32 %v2119_v41, %v2355_v26  ;;  %v453_v41 = vsel %vm158_vm0, %v1668_v7, 0.0 }
 0x1f3   :  { %v834_v47 = vsel %vm158_vm0, %v778_v10, 0.0  ;;  %vm742_vm12 = vcmp.eq.s32.totalorder %v2218_v19, %v652_v38  ;;  %vm745_vm15 = vcmp.eq.s32.totalorder %v2218_v19, %v661_v57  ;;  %v3353_v57 = vld [vmem:[#allocation7_spill] sm:$0xff] }
 0x1f4   :  { %v780_v28 = vsel %vm742_vm12, %v2048_v20, 0.0  ;;  %v363_v22 = vmul.f32 1.442695, %v299_v16  ;;  %v3350_v20 = vld [vmem:[#allocation6_spill] sm:$0xff] }
 0x1f5   :  { %v301_v9 = vsub.f32 %v3350_v20, %v2357_v11 }
 0x1f6   :  { %442 = vadd.xlane.f32.xlu1 %v441_v4  ;;  %829 = vadd.xlane.f32.xlu0 %v828_v32  ;;  %v667_v60 = vpop.permute.xlu1 %666  ;;  %v450_v4 = vsel %vm158_vm0, %v1666_v1, 0.0  ;;  %v837_v32 = vsel %vm158_vm0, %v779_v14, 0.0  ;;  %v658_v12 = vpop.permute.xlu0 %657  ;;  %1675 = vpow2.f32 %v363_v22  ;;  %v3351_v14 = vld [vmem:[#allocation13_spill] sm:$0xff] }
 0x1f7   :  { %vm744_vm14 = vcmp.eq.s32.totalorder %v2218_v19, %v658_v12  ;;  %1677 = vpow2.f32 %v365_v18  ;;  %v302_v16 = vsub.f32 %v3351_v14, %v2450_v24  ;;  %vm747_vm2 = vcmp.eq.s32.totalorder %v2218_v19, %v667_v60  ;;  %v3356_v60 = vld [vmem:[#allocation8_spill] sm:$0xff] }
 0x1f8   :  { %v782_v25 = vsel %vm744_vm14, %v2161_v53, 0.0  ;;  %v3352_v53 = vld [vmem:[#allocation27_spill] sm:$0xff] }
 0x1f9   :  { %v303_v22 = vsub.f32 %v3353_v57, %v3352_v53  ;;  %v369_v12 = vmul.f32 1.442695, %v302_v16 }
 0x1fa   :  { %445 = vadd.xlane.f32.xlu1 %v444_v0  ;;  %832 = vadd.xlane.f32.xlu0 %v831_v44  ;;  %v840_v0 = vsel %vm158_vm0, %v780_v28, 0.0  ;;  %v1670_v44 = vpop.eup %1669  ;;  %v2559_v10 = vpop.permute.xlu1 %672  ;;  %v783_v28 = vsel %vm745_vm15, %v2071_v27, 0.0 }
 0x1fb   :  { %v456_v38 = vsel %vm158_vm0, %v1670_v44, 0.0  ;;  %v664_v1 = vpop.permute.xlu0 %663  ;;  %v371_v8 = vmul.f32 1.442695, %v303_v22  ;;  %vm749_vm4 = vcmp.eq.s32.totalorder %v2218_v19, %v2559_v10  ;;  %v3357_v22 = vld [vmem:[#allocation15_spill] sm:$0xff]  ;;  %v3359_v10 = vld [vmem:[#allocation9_spill] sm:$0xff] }
 0x1fc   :  { %vm746_vm1 = vcmp.eq.s32.totalorder %v2218_v19, %v664_v1 }
 0x1fd   :  { %v784_v27 = vsel %vm746_vm1, %v2166_v54, 0.0  ;;  %v3355_v54 = vld [vmem:[#allocation28_spill] sm:$0xff] }
 0x1fe   :  { %448 = vadd.xlane.f32.xlu1 %v447_v39  ;;  %835 = vadd.xlane.f32.xlu0 %v834_v47  ;;  %v1672_v39 = vpop.eup %1671  ;;  %v367_v47 = vmul.f32 1.442695, %v301_v9  ;;  %v2570_v21 = vpop.permute.xlu1 %678  ;;  %v3354_v9 = vld [vmem:[#allocation14_spill] sm:$0xff] }
 0x1ff   :  { %v1674_v7 = vpop.eup %1673  ;;  %v670_v20 = vpop.permute.xlu0 %669  ;;  %v304_v18 = vsub.f32 %v3354_v9, %v2455_v33  ;;  %vm751_vm6 = vcmp.eq.s32.totalorder %v2218_v19, %v2570_v21 }
 0x200   :  { %1679 = vpow2.f32 %v367_v47  ;;  %v462_v43 = vsel %vm158_vm0, %v1674_v7, 0.0  ;;  %vm748_vm3 = vcmp.eq.s32.totalorder %v2218_v19, %v670_v20  ;;  %v305_v47 = vsub.f32 %v3356_v60, %v3355_v54 }
 0x201   :  { %1681 = vpow2.f32 %v369_v12  ;;  %v373_v1 = vmul.f32 1.442695, %v304_v18  ;;  %v306_v12 = vsub.f32 %v3357_v22, %v2462_v36 }
 0x202   :  { %451 = vadd.xlane.f32.xlu1 %v450_v4  ;;  %838 = vadd.xlane.f32.xlu0 %v837_v32  ;;  %v459_v4 = vsel %vm158_vm0, %v1672_v39, 0.0  ;;  %v846_v32 = vsel %vm158_vm0, %v782_v25, 0.0  ;;  %v2580_v44 = vpop.permute.xlu1 %684  ;;  %v785_v25 = vsel %vm747_vm2, %v2078_v29, 0.0  ;;  %1683 = vpow2.f32 %v371_v8 }
 0x203   :  { %v786_v29 = vsel %vm748_vm3, %v2177_v58, 0.0  ;;  %v375_v57 = vmul.f32 1.442695, %v305_v47  ;;  %1685 = vpow2.f32 %v373_v1  ;;  %v3358_v58 = vld [vmem:[#allocation29_spill] sm:$0xff]  ;;  %v377_v18 = vmul.f32 1.442695, %v306_v12 }
 0x204   :  { %v307_v20 = vsub.f32 %v3359_v10, %v3358_v58  ;;  %vm753_vm8 = vcmp.eq.s32.totalorder %v2218_v19, %v2580_v44 }
 0x205   :  { %1687 = vpow2.f32 %v375_v57 }
 0x206   :  { %454 = vadd.xlane.f32.xlu1 %v453_v41  ;;  %841 = vadd.xlane.f32.xlu0 %v840_v0  ;;  %v849_v41 = vsel %vm158_vm0, %v783_v28, 0.0  ;;  %v1676_v0 = vpop.eup %1675  ;;  %v2592_v16 = vpop.permute.xlu1 %690  ;;  %v379_v60 = vmul.f32 1.442695, %v307_v20  ;;  %1689 = vpow2.f32 %v377_v18 }
 0x207   :  { %v1678_v39 = vpop.eup %1677  ;;  %v676_v28 = vpop.permute.xlu0 %675  ;;  %vm755_vm10 = vcmp.eq.s32.totalorder %v2218_v19, %v2592_v16 }
 0x208   :  { %vm750_vm5 = vcmp.eq.s32.totalorder %v2218_v19, %v676_v28  ;;  %1691 = vpow2.f32 %v379_v60  ;;  %v3361_v28 = vld [vmem:[#allocation10_spill] sm:$0xff] }
 0x20a   :  { %457 = vadd.xlane.f32.xlu1 %v456_v38  ;;  %844 = vadd.xlane.f32.xlu0 %v843_v52  ;;  %v465_v38 = vsel %vm158_vm0, %v1676_v0, 0.0  ;;  %v852_v52 = vsel %vm158_vm0, %v784_v27, 0.0  ;;  %v1680_v7 = vpop.eup %1679  ;;  %v787_v27 = vsel %vm749_vm4, %v2085_v31, 0.0  ;;  %v2604_v8 = vpop.permute.xlu1 %696  ;;  %v788_v31 = vsel %vm750_vm5, %v2186_v61, 0.0  ;;  %v3360_v61 = vld [vmem:[#allocation30_spill] sm:$0xff] }
 0x20b   :  { %v1682_v0 = vpop.eup %1681  ;;  %v309_v21 = vsub.f32 %v3361_v28, %v3360_v61  ;;  %vm757_vm13 = vcmp.eq.s32.totalorder %v2218_v19, %v2604_v8 }
 0x20e   :  { %460 = vadd.xlane.f32.xlu1 %v459_v4  ;;  %847 = vadd.xlane.f32.xlu0 %v846_v32  ;;  %v468_v4 = vsel %vm158_vm0, %v1678_v39, 0.0  ;;  %v855_v32 = vsel %vm158_vm0, %v785_v25, 0.0  ;;  %v861_v39 = vsel %vm158_vm0, %v787_v27, 0.0  ;;  %v1684_v25 = vpop.eup %1683  ;;  %v2614_v47 = vpop.permute.xlu1 %702 }
 0x20f   :  { %v477_v1 = vsel %vm158_vm0, %v1684_v25, 0.0  ;;  %vm759_vm15 = vcmp.eq.s32.totalorder %v2218_v19, %v2614_v47 }
 0x212   :  { %463 = vadd.xlane.f32.xlu1 %v462_v43  ;;  %850 = vadd.xlane.f32.xlu0 %v849_v41  ;;  %v471_v43 = vsel %vm158_vm0, %v1680_v7, 0.0  ;;  %v858_v41 = vsel %vm158_vm0, %v786_v29, 0.0  ;;  %v789_v7 = vsel %vm751_vm6, %v2095_v34, 0.0 }
 0x213   :  { %v867_v12 = vsel %vm158_vm0, %v789_v7, 0.0 }
 0x216   :  { %466 = vadd.xlane.f32.xlu1 %v465_v38  ;;  %853 = vadd.xlane.f32.xlu0 %v852_v52  ;;  %v682_v38 = vpop.permute.xlu0 %681  ;;  %v474_v52 = vsel %vm158_vm0, %v1682_v0, 0.0  ;;  %v383_v0 = vmul.f32 1.442695, %v309_v21 }
 0x217   :  { %vm752_vm7 = vcmp.eq.s32.totalorder %v2218_v19, %v682_v38  ;;  %v791_v38 = vsel %vm753_vm8, %v2105_v37, 0.0 }
 0x218   :  { %v790_v34 = vsel %vm752_vm7, %v2195_v2, 0.0  ;;  %1693 = vpow2.f32 %v383_v0 }
 0x219   :  { %v870_v20 = vsel %vm158_vm0, %v790_v34, 0.0 }
 0x21a   :  { %469 = vadd.xlane.f32.xlu1 %v468_v4  ;;  %856 = vadd.xlane.f32.xlu0 %v855_v32  ;;  %v864_v4 = vsel %vm158_vm0, %v788_v31, 0.0  ;;  %v1686_v32 = vpop.eup %1685  ;;  %v688_v29 = vpop.permute.xlu0 %687 }
 0x21b   :  { %v480_v57 = vsel %vm158_vm0, %v1686_v32, 0.0  ;;  %vm754_vm9 = vcmp.eq.s32.totalorder %v2218_v19, %v688_v29  ;;  %v3362_v32 = vld [vmem:[#allocation17_spill] sm:$0xff] }
 0x21c   :  { %v792_v25 = vsel %vm754_vm9, %v2204_v6, 0.0 }
 0x21d   :  { %v876_v60 = vsel %vm158_vm0, %v792_v25, 0.0 }
 0x21e   :  { %472 = vadd.xlane.f32.xlu1 %v471_v43  ;;  %859 = vadd.xlane.f32.xlu0 %v858_v41  ;;  %v1688_v43 = vpop.eup %1687  ;;  %v2624_v41 = vpop.permute.xlu1 %720 }
 0x21f   :  { %v694_v27 = vpop.permute.xlu0 %693  ;;  %v483_v10 = vsel %vm158_vm0, %v1688_v43, 0.0  ;;  %v1690_v18 = vpop.eup %1689  ;;  %v1928_v43 = vld [vmem:[%s3264_s0 + $0xd0] sm:$0xff]  ;;  %vm765_vm6 = vcmp.eq.s32.totalorder %v2218_v19, %v2624_v41 }
 0x220   :  { %v486_v2 = vsel %vm158_vm0, %v1690_v18, 0.0  ;;  %v1692_v44 = vpop.eup %1691  ;;  %vm756_vm12 = vcmp.eq.s32.totalorder %v2218_v19, %v694_v27  ;;  %v795_v34 = vsel %vm757_vm13, %v1928_v43, 0.0 }
 0x221   :  { %v489_v37 = vsel %vm158_vm0, %v1692_v44, 0.0  ;;  %v794_v21 = vsel %vm756_vm12, %v2213_v15, 0.0  ;;  %v885_v15 = vsel %vm158_vm0, %v795_v34, 0.0  ;;  %v1930_v44 = vld [vmem:[%s3264_s0 + $0xf0] sm:$0xff] }
 0x222   :  { %475 = vadd.xlane.f32.xlu1 %v474_v52  ;;  %862 = vadd.xlane.f32.xlu0 %v861_v39  ;;  %v730_v52 = vpop.permute.xlu1 %729  ;;  %v873_v39 = vsel %vm158_vm0, %v791_v38, 0.0  ;;  %v1694_v28 = vpop.eup %1693 }
 0x223   :  { %v700_v31 = vpop.permute.xlu0 %699  ;;  %vm768_vm11 = vcmp.eq.s32.totalorder %v2218_v19, %v730_v52 }
 0x224   :  { %v806_v7 = vsel %vm768_vm11, %v3362_v32, 0.0  ;;  %vm758_vm14 = vcmp.eq.s32.totalorder %v2218_v19, %v700_v31 }
 0x225   :  { %v918_v16 = vsel %vm158_vm0, %v806_v7, 0.0  ;;  %v796_v27 = vsel %vm758_vm14, %v2225_v23, 0.0  ;;  %v1931_v7 = vld [vmem:[%s3264_s0 + $0x100] sm:$0xff] }
 0x226   :  { %478 = vadd.xlane.f32.xlu1 %v477_v1  ;;  %865 = vadd.xlane.f32.xlu0 %v864_v4  ;;  %v1927_v1 = vld [vmem:[%s3264_s0 + $0xc0] sm:$0xff] }
 0x227   :  { %v793_v4 = vsel %vm755_vm10, %v1927_v1, 0.0  ;;  %v706_v6 = vpop.permute.xlu0 %705  ;;  %vm80_vm10 = vcmask 0  }
 0x228   :  { %v879_v29 = vsel %vm158_vm0, %v793_v4, 0.0  ;;  %vm760_vm1 = vcmp.eq.s32.totalorder %v2218_v19, %v706_v6 }
 0x229   :  { %v798_v23 = vsel %vm760_vm1, %v3351_v14, 0.0 }
 0x22a   :  { %481 = vadd.xlane.f32.xlu1 %v480_v57  ;;  %868 = vadd.xlane.f32.xlu0 %v867_v12  ;;  %v495_v57 = vsel %vm158_vm0, %v1694_v28, 0.0  ;;  %v882_v12 = vsel %vm158_vm0, %v794_v21, 0.0 }
 0x22b   :  { %v709_v0 = vpop.permute.xlu0 %708 }
 0x22c   :  { %vm761_vm2 = vcmp.eq.s32.totalorder %v2218_v19, %v709_v0  ;;  %v310_v0 = vsub.f32 %v3362_v32, %v2477_v46 }
 0x22d   :  { %v799_v25 = vsel %vm761_vm2, %v1930_v44, 0.0 }
 0x22e   :  { %484 = vadd.xlane.f32.xlu1 %v483_v10  ;;  %871 = vadd.xlane.f32.xlu0 %v870_v20  ;;  %v888_v10 = vsel %vm158_vm0, %v796_v27, 0.0  ;;  %v1929_v20 = vld [vmem:[%s3264_s0 + $0xe0] sm:$0xff]  ;;  %v897_v14 = vsel %vm158_vm0, %v799_v25, 0.0  ;;  %v385_v32 = vmul.f32 1.442695, %v310_v0  ;;  %v1933_v25 = vld [vmem:[%s3264_s0 + $0x118] sm:$0xff] }
 0x22f   :  { %v712_v8 = vpop.permute.xlu0 %711  ;;  %v797_v18 = vsel %vm759_vm15, %v1929_v20, 0.0  ;;  %v3366_v20 = vld [vmem:[#allocation31_spill] sm:$0xff] }
 0x230   :  { %v891_v52 = vsel %vm158_vm0, %v797_v18, 0.0  ;;  %vm762_vm3 = vcmp.eq.s32.totalorder %v2218_v19, %v712_v8 }
 0x232   :  { %487 = vadd.xlane.f32.xlu1 %v486_v2  ;;  %874 = vadd.xlane.f32.xlu0 %v873_v39  ;;  %v894_v39 = vsel %vm158_vm0, %v798_v23, 0.0 }
 0x233   :  { %v715_v47 = vpop.permute.xlu0 %714 }
 0x234   :  { %vm763_vm4 = vcmp.eq.s32.totalorder %v2218_v19, %v715_v47 }
 0x235   :  { %v801_v6 = vsel %vm763_vm4, %v1931_v7, 0.0 }
 0x236   :  { %490 = vadd.xlane.f32.xlu1 %v489_v37  ;;  %877 = vadd.xlane.f32.xlu0 %v876_v60  ;;  %v800_v60 = vsel %vm762_vm3, %v3354_v9, 0.0  ;;  %v903_v21 = vsel %vm158_vm0, %v801_v6, 0.0 }
 0x237   :  { %v718_v37 = vpop.permute.xlu0 %717  ;;  %v900_v4 = vsel %vm158_vm0, %v800_v60, 0.0 }
 0x238   :  { %vm764_vm5 = vcmp.eq.s32.totalorder %v2218_v19, %v718_v37 }
 0x23a   :  { %919 = vadd.xlane.f32.xlu1 %v918_v16  ;;  %880 = vadd.xlane.f32.xlu0 %v879_v29  ;;  %v3363_v29 = vld [vmem:[#allocation16_spill] sm:$0xff] }
 0x23b   :  { %v724_v16 = vpop.permute.xlu0 %723  ;;  %v308_v28 = vsub.f32 %v3363_v29, %v2468_v42 }
 0x23c   :  { %vm766_vm7 = vcmp.eq.s32.totalorder %v2218_v19, %v724_v16 }
 0x23d   :  { %v381_v34 = vmul.f32 1.442695, %v308_v28  ;;  %v804_v37 = vsel %vm766_vm7, %v1933_v25, 0.0  ;;  %v961_v28 = vsub.f32 %v2490_v5, %v2170_v56 }
 0x23e   :  { %496 = vadd.xlane.f32.xlu1 %v495_v57  ;;  %883 = vadd.xlane.f32.xlu0 %v882_v12  ;;  %v802_v57 = vsel %vm764_vm5, %v3357_v22, 0.0  ;;  %v3364_v12 = vld [vmem:[#allocation19_spill] sm:$0xff]  ;;  %v912_v60 = vsel %vm158_vm0, %v804_v37, 0.0  ;;  %v3367_v37 = vld [vmem:[#allocation20_spill] sm:$0xff] }
 0x23f   :  { %v960_v43 = vsub.f32 %v2483_v3, %v3364_v12  ;;  %v727_v27 = vpop.permute.xlu0 %726  ;;  %v906_v8 = vsel %vm158_vm0, %v802_v57, 0.0  ;;  %1695 = vpow2.f32 %v381_v34 }
 0x240   :  { %vm767_vm8 = vcmp.eq.s32.totalorder %v2218_v19, %v727_v27 }
 0x241   :  { %v999_v22 = vmul.f32 1.442695, %v960_v43 }
 0x242   :  { %886 = vadd.xlane.f32.xlu0 %v885_v15 }
 0x243   :  { %v389_v47 = vpop.xlane.xlu0 %388 }
 0x246   :  { %889 = vadd.xlane.f32.xlu0 %v888_v10  ;;  %v3365_v10 = vld [vmem:[#allocation18_spill] sm:$0xff] }
 0x247   :  { %v2666_v38 = vpop.xlane.xlu1 %391  ;;  %v959_v18 = vsub.f32 %v3366_v20, %v3365_v10 }
 0x248   :  { %1697 = vrcp.f32 %v2666_v38 }
 0x249   :  { %v997_v44 = vmul.f32 1.442695, %v959_v18  ;;  %v1696_v16 = vpop.eup %1695 }
 0x24a   :  { %892 = vadd.xlane.f32.xlu0 %v891_v52  ;;  %v1932_v52 = vld [vmem:[%s3264_s0 + $0x110] sm:$0xff] }
 0x24b   :  { %v2671_v2 = vpop.xlane.xlu1 %400  ;;  %v803_v23 = vsel %vm765_vm6, %v1932_v52, 0.0 }
 0x24c   :  { %1699 = vlog2.f32 %v2671_v2 }
 0x24d   :  { %1701 = vpow2.f32 %v999_v22  ;;  %v1001_v22 = vmul.f32 1.442695, %v961_v28 }
 0x24e   :  { %895 = vadd.xlane.f32.xlu0 %v894_v39  ;;  %v909_v39 = vsel %vm158_vm0, %v803_v23, 0.0  ;;  %1703 = vpow2.f32 %v385_v32 }
 0x24f   :  { %v2678_v31 = vpop.xlane.xlu1 %403  ;;  %1705 = vrcp.f32 %v389_v47 }
 0x250   :  { %1707 = vpow2.f32 %v997_v44 }
 0x251   :  { %1709 = vlog2.f32 %v2678_v31 }
 0x252   :  { %898 = vadd.xlane.f32.xlu0 %v897_v14  ;;  %v1698_v29 = vpop.eup %1697  ;;  %1711 = vlog2.f32 %v2666_v38 }
 0x253   :  { %v2683_v1 = vpop.xlane.xlu1 %406  ;;  %1713 = vlog2.f32 %v389_v47 }
 0x254   :  { %1715 = vlog2.f32 %v2683_v1 }
 0x255   :  { %1717 = vpow2.f32 %v1001_v22 }
 0x256   :  { %901 = vadd.xlane.f32.xlu0 %v900_v4  ;;  %v1934_v4 = vld [vmem:[%s3264_s0 + $0x120] sm:$0xff] }
 0x257   :  { %v2692_v9 = vpop.xlane.xlu1 %409  ;;  %v805_v7 = vsel %vm767_vm8, %v1934_v4, 0.0 }
 0x258   :  { %v915_v19 = vsel %vm158_vm0, %v805_v7, 0.0 }
 0x25a   :  { %904 = vadd.xlane.f32.xlu0 %v903_v21  ;;  %v1700_v21 = vpop.eup %1699 }
 0x25b   :  { %v2702_v15 = vpop.xlane.xlu1 %412  ;;  %v1702_v34 = vpop.eup %1701  ;;  %v510_v52 = vmul.f32 0.6931472, %v1700_v21 }
 0x25c   :  { %v1704_v0 = vpop.eup %1703  ;;  %v1112_v27 = vmul.f32 %v1702_v34, %v1698_v29 }
 0x25d   :  { %v1706_v18 = vpop.eup %1705  ;;  %v498_v25 = vsel %vm158_vm0, %v1704_v0, 0.0 }
 0x25e   :  { %907 = vadd.xlane.f32.xlu0 %v906_v8  ;;  %v492_v8 = vsel %vm158_vm0, %v1696_v16, 0.0  ;;  %v1708_v38 = vpop.eup %1707  ;;  %v1150_v44 = vsub.f32 1.0, %v1112_v27  ;;  %vm1496_vm0 = vcmask 7168  }
 0x25f   :  { %v2711_v41 = vpop.xlane.xlu1 %415  ;;  %v1710_v4 = vpop.eup %1709 }
 0x260   :  { %v1712_v28 = vpop.eup %1711  ;;  %v1188_v34 = vmax.f32 %v1150_v44, 0.0  ;;  %v512_v27 = vmul.f32 0.6931472, %v1710_v4 }
 0x261   :  { %v1714_v0 = vpop.eup %1713 }
 0x262   :  { %910 = vadd.xlane.f32.xlu0 %v909_v39  ;;  %v1111_v39 = vmul.f32 %v1708_v38, %v1706_v18  ;;  %v1716_v22 = vpop.eup %1715  ;;  %v1226_v61 = vmul.f32 %v1188_v34, %v1188_v34 }
 0x263   :  { %v2720_v14 = vpop.xlane.xlu1 %418  ;;  %v514_v42 = vmul.f32 0.6931472, %v1716_v22 }
 0x264   :  { %v1149_v21 = vsub.f32 1.0, %v1111_v39  ;;  %v2759_v39 = vadd.f32 %v512_v27, %v2188_v62  ;;  %v1264_v27 = vmul.f32 0.25, %v1226_v61 }
 0x266   :  { %913 = vadd.xlane.f32.xlu0 %v912_v60  ;;  %v2745_v60 = vadd.f32 %v510_v52, %v3367_v37 }
 0x267   :  { %v2726_v6 = vpop.xlane.xlu1 %421 }
 0x26a   :  { %916 = vadd.xlane.f32.xlu0 %v915_v19  ;;  %v1187_v19 = vmax.f32 %v1149_v21, 0.0 }
 0x26b   :  { %v2733_v57 = vpop.xlane.xlu1 %424  ;;  %v2735_v43 = vpop.xlane.xlu0 %817 }
 0x26c   :  { %v962_v47 = vsub.f32 %v2735_v43, %v2179_v59  ;;  %v1225_v21 = vmul.f32 %v1187_v19, %v1187_v19 }
 0x26e   :  { %493 = vadd.xlane.f32.xlu0 %v492_v8  ;;  %v1003_v8 = vmul.f32 1.442695, %v962_v47  ;;  %v1263_v61 = vmul.f32 0.25, %v1225_v21 }
 0x26f   :  { %v2739_v23 = vpop.xlane.xlu1 %427  ;;  %v395_v32 = vpop.xlane.xlu0 %394 }
 0x270   :  { %1719 = vlog2.f32 %v395_v32 }
 0x271   :  { %1721 = vrcp.f32 %v395_v32  ;;  %v504_v32 = vmul.f32 0.6931472, %v1712_v28 }
 0x272   :  { %499 = vadd.xlane.f32.xlu0 %v498_v25  ;;  %1723 = vrcp.f32 %v2671_v2  ;;  %v502_v25 = vmul.f32 0.6931472, %v1714_v0 }
 0x273   :  { %v2747_v7 = vpop.xlane.xlu1 %430  ;;  %v2749_v16 = vpop.xlane.xlu0 %820  ;;  %v578_v2 = vadd.f32 %v504_v32, %v3364_v12 }
 0x274   :  { %v963_v29 = vsub.f32 %v2749_v16, %v3367_v37  ;;  %v1718_v37 = vpop.eup %1717  ;;  %v577_v0 = vadd.f32 %v502_v25, %v3365_v10 }
 0x276   :  { %v1005_v18 = vmul.f32 1.442695, %v963_v29 }
 0x277   :  { %v2756_v52 = vpop.xlane.xlu1 %433  ;;  %v398_v38 = vpop.xlane.xlu0 %397 }
 0x278   :  { %1725 = vpow2.f32 %v1005_v18  ;;  %v3368_v18 = vld [vmem:[#allocation21_spill] sm:$0xff] }
 0x279   :  { %1727 = vpow2.f32 %v1003_v8  ;;  %v2772_v22 = vadd.f32 %v514_v42, %v3368_v18 }
 0x27a   :  { %1729 = vlog2.f32 %v398_v38  ;;  %v1720_v28 = vpop.eup %1719 }
 0x27b   :  { %v2761_v44 = vpop.xlane.xlu1 %436  ;;  %v2763_v47 = vpop.xlane.xlu0 %823  ;;  %1731 = vrcp.f32 %v398_v38  ;;  %v506_v12 = vmul.f32 0.6931472, %v1720_v28 }
 0x27c   :  { %v964_v29 = vsub.f32 %v2763_v47, %v2188_v62  ;;  %v1722_v34 = vpop.eup %1721  ;;  %1733 = vrcp.f32 %v2678_v31  ;;  %v922_v62 = vsub.f32 %v578_v2, %v2483_v3  ;;  %v921_v31 = vsub.f32 %v577_v0, %v3366_v20 }
 0x27d   :  { %v1113_v38 = vmul.f32 %v1722_v34, %v1718_v37  ;;  %v1724_v10 = vpop.eup %1723  ;;  %v579_v28 = vadd.f32 %v506_v12, %v2170_v56 }
 0x27e   :  { %v1007_v8 = vmul.f32 1.442695, %v964_v29  ;;  %v1302_v37 = vmul.f32 %v1264_v27, %v922_v62  ;;  %v1301_v0 = vmul.f32 %v1263_v61, %v921_v31 }
 0x27f   :  { %v2775_v32 = vpop.xlane.xlu1 %439  ;;  %v2777_v4 = vpop.xlane.xlu0 %826  ;;  %v1151_v25 = vsub.f32 1.0, %v1113_v38 }
 0x280   :  { %1735 = vpow2.f32 %v1007_v8  ;;  %v965_v42 = vsub.f32 %v2777_v4, %v3368_v18  ;;  %v3369_v18 = vld [vmem:[#allocation11_spill] sm:$0xff]  ;;  %v1498_v12 = vsel %vm1496_vm0, %v1302_v37, 0.0 }
 0x281   :  { %1737 = vrcp.f32 %v2683_v1  ;;  %v1189_v34 = vmax.f32 %v1151_v25, 0.0  ;;  %v923_v25 = vsub.f32 %v579_v28, %v2490_v5  ;;  %v3370_v28 = vld [vmem:[#allocation22_spill] sm:$0xff] }
 0x282   :  { %v1726_v29 = vpop.eup %1725  ;;  %v1009_v2 = vmul.f32 1.442695, %v965_v42  ;;  %1739 = vlog2.f32 %v2692_v9 }
 0x283   :  { %v1115_v3 = vmul.f32 %v1726_v29, %v1724_v10  ;;  %v2787_v8 = vpop.xlane.xlu1 %442  ;;  %v2789_v19 = vpop.xlane.xlu0 %829  ;;  %v1227_v27 = vmul.f32 %v1189_v34, %v1189_v34  ;;  %v1497_v34 = vsel %vm1496_vm0, %v1301_v0, 0.0 }
 0x284   :  { %v1728_v21 = vpop.eup %1727  ;;  %v966_v38 = vsub.f32 %v2789_v19, %v3369_v18  ;;  %1741 = vpow2.f32 %v1009_v2 }
 0x285   :  { %v1730_v20 = vpop.eup %1729  ;;  %v1153_v1 = vsub.f32 1.0, %v1115_v3  ;;  %1743 = vrcp.f32 %v2692_v9  ;;  %v1265_v42 = vmul.f32 0.25, %v1227_v27 }
 0x286   :  { %v1732_v56 = vpop.eup %1731  ;;  %v508_v62 = vmul.f32 0.6931472, %v1730_v20  ;;  %v1011_v10 = vmul.f32 1.442695, %v966_v38  ;;  %v1499_v38 = vadd.f32 %v1498_v12, %v1497_v34 }
 0x287   :  { %v1191_v29 = vmax.f32 %v1153_v1, 0.0  ;;  %v1114_v58 = vmul.f32 %v1732_v56, %v1728_v21  ;;  %v2797_v36 = vpop.xlane.xlu1 %445  ;;  %v2799_v54 = vpop.xlane.xlu0 %832  ;;  %v1303_v37 = vmul.f32 %v1265_v42, %v923_v25 }
 0x288   :  { %v580_v61 = vadd.f32 %v508_v62, %v2179_v59  ;;  %1745 = vpow2.f32 %v1011_v10  ;;  %v1734_v31 = vpop.eup %1733  ;;  %v967_v21 = vsub.f32 %v2799_v54, %v3370_v28 }
 0x289   :  { %v1229_v3 = vmul.f32 %v1191_v29, %v1191_v29  ;;  %v1152_v9 = vsub.f32 1.0, %v1114_v58  ;;  %1747 = vlog2.f32 %v2702_v15  ;;  %v1500_v20 = vsel %vm1496_vm0, %v1303_v37, 0.0 }
 0x28a   :  { %v1736_v2 = vpop.eup %1735  ;;  %v924_v5 = vsub.f32 %v580_v61, %v2735_v43  ;;  %1749 = vrcp.f32 %v2702_v15  ;;  %v1501_v58 = vadd.f32 %v1500_v20, %v1499_v38  ;;  %v1013_v12 = vmul.f32 1.442695, %v967_v21  ;;  %v3372_v61 = vld [vmem:[#allocation12_spill] sm:$0xff]  ;;  %v3373_v20 = vld [vmem:[#allocation23_spill] sm:$0xff] }
 0x28b   :  { %v1267_v27 = vmul.f32 0.25, %v1229_v3  ;;  %v1190_v59 = vmax.f32 %v1152_v9, 0.0  ;;  %v1116_v1 = vmul.f32 %v1736_v2, %v1734_v31  ;;  %v2808_v56 = vpop.xlane.xlu1 %448  ;;  %v2810_v0 = vpop.xlane.xlu0 %835  ;;  %1751 = vlog2.f32 %v2711_v41 }
 0x28c   :  { %v1738_v62 = vpop.eup %1737  ;;  %v3371_v43 = vsub.f32 %v2745_v60, %v2749_v16  ;;  %1753 = vpow2.f32 %v1013_v12  ;;  %v968_v31 = vsub.f32 %v2810_v0, %v3372_v61 }
 0x28d   :  { %v1228_v25 = vmul.f32 %v1190_v59, %v1190_v59  ;;  %v1154_v42 = vsub.f32 1.0, %v1116_v1  ;;  %v1740_v29 = vpop.eup %1739  ;;  %1755 = vrcp.f32 %v2711_v41 }
 0x28e   :  { %v1305_v10 = vmul.f32 %v1267_v27, %v3371_v43  ;;  %v1742_v34 = vpop.eup %1741  ;;  %1757 = vlog2.f32 %v2720_v14  ;;  %v1015_v16 = vmul.f32 1.442695, %v968_v31  ;;  %v516_v31 = vmul.f32 0.6931472, %v1740_v29 }
 0x28f   :  { %v1266_v37 = vmul.f32 0.25, %v1228_v25  ;;  %v1192_v15 = vmax.f32 %v1154_v42, 0.0  ;;  %v2820_v3 = vpop.xlane.xlu1 %451  ;;  %v2822_v9 = vpop.xlane.xlu0 %838  ;;  %v1117_v60 = vmul.f32 %v1742_v34, %v1738_v62  ;;  %1759 = vlog2.f32 %v2726_v6 }
 0x290   :  { %v1744_v2 = vpop.eup %1743  ;;  %v969_v27 = vsub.f32 %v2822_v9, %v3373_v20  ;;  %1761 = vpow2.f32 %v1015_v16 }
 0x291   :  { %v1304_v38 = vmul.f32 %v1266_v37, %v924_v5  ;;  %v1230_v21 = vmul.f32 %v1192_v15, %v1192_v15  ;;  %v1155_v41 = vsub.f32 1.0, %v1117_v60  ;;  %1763 = vrcp.f32 %v2720_v14 }
 0x292   :  { %v1746_v59 = vpop.eup %1745  ;;  %v1017_v25 = vmul.f32 1.442695, %v969_v27  ;;  %v1504_v37 = vsel %vm1496_vm0, %v1305_v10, 0.0  ;;  %v3374_v15 = vsub.f32 %v2759_v39, %v2763_v47 }
 0x293   :  { %v1502_v1 = vsel %vm1496_vm0, %v1304_v38, 0.0  ;;  %v1268_v12 = vmul.f32 0.25, %v1230_v21  ;;  %v1118_v43 = vmul.f32 %v1746_v59, %v1744_v2  ;;  %v2829_v42 = vpop.xlane.xlu1 %454  ;;  %v2831_v33 = vpop.xlane.xlu0 %841  ;;  %v1193_v34 = vmax.f32 %v1155_v41, 0.0 }
 0x294   :  { %v1748_v62 = vpop.eup %1747  ;;  %v1503_v5 = vadd.f32 %v1502_v1, %v1501_v58  ;;  %1765 = vpow2.f32 %v1017_v25  ;;  %v970_v27 = vsub.f32 %v2831_v33, %v2215_v17  ;;  %v584_v25 = vadd.f32 %v516_v31, %v3369_v18 }
 0x295   :  { %v1306_v60 = vmul.f32 %v1268_v12, %v3374_v15  ;;  %v1156_v16 = vsub.f32 1.0, %v1118_v43  ;;  %v1750_v2 = vpop.eup %1749  ;;  %v1231_v21 = vmul.f32 %v1193_v34, %v1193_v34  ;;  %v518_v29 = vmul.f32 0.6931472, %v1748_v62  ;;  %v3376_v15 = vld [vmem:[#allocation24_spill] sm:$0xff] }
 0x296   :  { %v1505_v38 = vadd.f32 %v1504_v37, %v1503_v5  ;;  %v1752_v59 = vpop.eup %1751  ;;  %1767 = vrcp.f32 %v2726_v6  ;;  %v1019_v1 = vmul.f32 1.442695, %v970_v27  ;;  %v3375_v34 = vsub.f32 %v2772_v22, %v2777_v4 }
 0x297   :  { %v1506_v14 = vsel %vm1496_vm0, %v1306_v60, 0.0  ;;  %v1194_v58 = vmax.f32 %v1156_v16, 0.0  ;;  %v2842_v10 = vpop.xlane.xlu0 %844  ;;  %v1754_v41 = vpop.eup %1753  ;;  %1769 = vlog2.f32 %v2733_v57  ;;  %v1269_v47 = vmul.f32 0.25, %v1231_v21 }
 0x298   :  { %v1507_v39 = vadd.f32 %v1506_v14, %v1505_v38  ;;  %v2845_v12 = vpop.xlane.xlu1 %457  ;;  %v1756_v43 = vpop.eup %1755  ;;  %1771 = vrcp.f32 %v2733_v57  ;;  %v1119_v6 = vmul.f32 %v1754_v41, %v1750_v2  ;;  %v971_v60 = vsub.f32 %v2842_v10, %v3376_v15 }
 0x299   :  { %v1232_v62 = vmul.f32 %v1194_v58, %v1194_v58  ;;  %v1758_v5 = vpop.eup %1757  ;;  %v1307_v37 = vmul.f32 %v1269_v47, %v3375_v34  ;;  %1773 = vpow2.f32 %v1019_v1  ;;  %v928_v38 = vsub.f32 %v584_v25, %v2789_v19  ;;  %v3377_v25 = vld [vmem:[#allocation32_spill] sm:$0xff] }
 0x29a   :  { %v1760_v16 = vpop.eup %1759  ;;  %1775 = vlog2.f32 %v2739_v23  ;;  %v1157_v57 = vsub.f32 1.0, %v1119_v6  ;;  %v585_v4 = vadd.f32 %v518_v29, %v3370_v28  ;;  %v1021_v22 = vmul.f32 1.442695, %v971_v60 }
 0x29b   :  { %v1270_v21 = vmul.f32 0.25, %v1232_v62  ;;  %v2856_v27 = vpop.xlane.xlu0 %847  ;;  %v1762_v18 = vpop.eup %1761  ;;  %1777 = vrcp.f32 %v2739_v23  ;;  %v1508_v31 = vsel %vm1496_vm0, %v1307_v37, 0.0  ;;  %v520_v1 = vmul.f32 0.6931472, %v1752_v59 }
 0x29c   :  { %v1509_v2 = vadd.f32 %v1508_v31, %v1507_v39  ;;  %v1195_v58 = vmax.f32 %v1157_v57, 0.0  ;;  %v1120_v41 = vmul.f32 %v1762_v18, %v1756_v43  ;;  %v1764_v47 = vpop.eup %1763  ;;  %v522_v34 = vmul.f32 0.6931472, %v1758_v5  ;;  %v2861_v19 = vpop.xlane.xlu1 %460  ;;  %v3378_v31 = vld [vmem:[#allocation25_spill] sm:$0xff] }
 0x29d   :  { %v1308_v14 = vmul.f32 %v1270_v21, %v928_v38  ;;  %1779 = vpow2.f32 %v1021_v22  ;;  %v972_v62 = vsub.f32 %v2856_v27, %v3377_v25  ;;  %v524_v23 = vmul.f32 0.6931472, %v1760_v16 }
 0x29e   :  { %v1766_v6 = vpop.eup %1765  ;;  %v1233_v46 = vmul.f32 %v1195_v58, %v1195_v58  ;;  %v1158_v28 = vsub.f32 1.0, %v1120_v41  ;;  %1781 = vlog2.f32 %v2747_v7  ;;  %v929_v60 = vsub.f32 %v585_v4, %v2799_v54 }
 0x29f   :  { %v1510_v37 = vsel %vm1496_vm0, %v1308_v14, 0.0  ;;  %v2866_v29 = vpop.xlane.xlu0 %850  ;;  %v1121_v43 = vmul.f32 %v1766_v6, %v1764_v47  ;;  %v1023_v59 = vmul.f32 1.442695, %v972_v62  ;;  %1783 = vrcp.f32 %v2747_v7 }
 0x2a0   :  { %v1511_v39 = vadd.f32 %v1510_v37, %v1509_v2  ;;  %v1768_v5 = vpop.eup %1767  ;;  %v1271_v38 = vmul.f32 0.25, %v1233_v46  ;;  %v1196_v21 = vmax.f32 %v1158_v28, 0.0  ;;  %v586_v16 = vadd.f32 %v520_v1, %v3372_v61  ;;  %v2880_v4 = vpop.xlane.xlu1 %463 }
 0x2a1   :  { %v1770_v57 = vpop.eup %1769  ;;  %v1159_v18 = vsub.f32 1.0, %v1121_v43  ;;  %1785 = vpow2.f32 %v1023_v59  ;;  %v973_v22 = vsub.f32 %v2866_v29, %v3378_v31  ;;  %v587_v41 = vadd.f32 %v522_v34, %v3373_v20 }
 0x2a2   :  { %v1772_v14 = vpop.eup %1771  ;;  %1787 = vlog2.f32 %v2756_v52  ;;  %v1309_v2 = vmul.f32 %v1271_v38, %v929_v60  ;;  %v1234_v58 = vmul.f32 %v1196_v21, %v1196_v21  ;;  %v588_v61 = vadd.f32 %v524_v23, %v2215_v17 }
 0x2a3   :  { %v2876_v7 = vpop.xlane.xlu0 %853  ;;  %v1774_v54 = vpop.eup %1773  ;;  %1789 = vrcp.f32 %v2756_v52  ;;  %v1197_v46 = vmax.f32 %v1159_v18, 0.0  ;;  %v1025_v47 = vmul.f32 1.442695, %v973_v22  ;;  %v930_v6 = vsub.f32 %v586_v16, %v2810_v0 }
 0x2a4   :  { %v1776_v1 = vpop.eup %1775  ;;  %v1512_v62 = vsel %vm1496_vm0, %v1309_v2, 0.0  ;;  %v1272_v37 = vmul.f32 0.25, %v1234_v58  ;;  %v1122_v28 = vmul.f32 %v1774_v54, %v1768_v5  ;;  %v974_v52 = vsub.f32 %v2876_v7, %v2417_v51  ;;  %v2893_v58 = vpop.xlane.xlu1 %466  ;;  %v3379_v54 = vld [vmem:[#allocation26_spill] sm:$0xff] }
 0x2a5   :  { %v1778_v43 = vpop.eup %1777  ;;  %v1513_v20 = vadd.f32 %v1512_v62, %v1511_v39  ;;  %v1235_v34 = vmul.f32 %v1197_v46, %v1197_v46  ;;  %1791 = vpow2.f32 %v1025_v47  ;;  %v526_v59 = vmul.f32 0.6931472, %v1770_v57 }
 0x2a6   :  { %1793 = vlog2.f32 %v2761_v44  ;;  %v1310_v17 = vmul.f32 %v1272_v37, %v930_v6  ;;  %v1160_v23 = vsub.f32 1.0, %v1122_v28  ;;  %v931_v0 = vsub.f32 %v587_v41, %v2822_v9 }
 0x2a7   :  { %v2887_v60 = vpop.xlane.xlu0 %856  ;;  %v1780_v38 = vpop.eup %1779  ;;  %1795 = vrcp.f32 %v2761_v44  ;;  %v1273_v5 = vmul.f32 0.25, %v1235_v34  ;;  %v1027_v21 = vmul.f32 1.442695, %v974_v52  ;;  %v932_v6 = vsub.f32 %v588_v61, %v2831_v33 }
 0x2a8   :  { %1797 = vlog2.f32 %v2775_v32  ;;  %v1514_v39 = vsel %vm1496_vm0, %v1310_v17, 0.0  ;;  %v1198_v16 = vmax.f32 %v1160_v23, 0.0  ;;  %v1123_v18 = vmul.f32 %v1780_v38, %v1772_v14  ;;  %v1782_v57 = vpop.eup %1781 }
 0x2a9   :  { %v1515_v22 = vadd.f32 %v1514_v39, %v1513_v20  ;;  %v1311_v2 = vmul.f32 %v1273_v5, %v931_v0  ;;  %1799 = vpow2.f32 %v1027_v21  ;;  %v975_v46 = vsub.f32 %v2887_v60, %v3379_v54  ;;  %v1784_v44 = vpop.eup %1783 }
 0x2aa   :  { %1801 = vrcp.f32 %v2775_v32  ;;  %v1236_v9 = vmul.f32 %v1198_v16, %v1198_v16  ;;  %v1161_v41 = vsub.f32 1.0, %v1123_v18  ;;  %v528_v38 = vmul.f32 0.6931472, %v1776_v1  ;;  %v2911_v1 = vpop.xlane.xlu1 %469 }
 0x2ab   :  { %v2898_v47 = vpop.xlane.xlu0 %859  ;;  %v1786_v62 = vpop.eup %1785  ;;  %1803 = vlog2.f32 %v2787_v8  ;;  %v1516_v14 = vsel %vm1496_vm0, %v1311_v2, 0.0  ;;  %v1029_v37 = vmul.f32 1.442695, %v975_v46  ;;  %v589_v32 = vadd.f32 %v526_v59, %v3376_v15 }
 0x2ac   :  { %v1788_v28 = vpop.eup %1787  ;;  %v1517_v20 = vadd.f32 %v1516_v14, %v1515_v22  ;;  %v1274_v34 = vmul.f32 0.25, %v1236_v9  ;;  %v1199_v52 = vmax.f32 %v1161_v41, 0.0  ;;  %v1124_v17 = vmul.f32 %v1786_v62, %v1778_v43 }
 0x2ad   :  { %v1790_v23 = vpop.eup %1789  ;;  %1805 = vpow2.f32 %v1029_v37  ;;  %v976_v0 = vsub.f32 %v2898_v47, %v2425_v13  ;;  %v530_v16 = vmul.f32 0.6931472, %v1782_v57  ;;  %v933_v43 = vsub.f32 %v589_v32, %v2842_v10 }
 0x2ae   :  { %1807 = vrcp.f32 %v2787_v8  ;;  %v1312_v5 = vmul.f32 %v1274_v34, %v932_v6  ;;  %v1237_v21 = vmul.f32 %v1199_v52, %v1199_v52  ;;  %v1162_v39 = vsub.f32 1.0, %v1124_v17 }
 0x2af   :  { %v2907_v33 = vpop.xlane.xlu0 %862  ;;  %v1792_v61 = vpop.eup %1791  ;;  %1809 = vlog2.f32 %v2797_v36  ;;  %v1031_v15 = vmul.f32 1.442695, %v976_v0  ;;  %v590_v41 = vadd.f32 %v528_v38, %v3377_v25 }
 0x2b0   :  { %v1794_v59 = vpop.eup %1793  ;;  %v1518_v18 = vsel %vm1496_vm0, %v1312_v5, 0.0  ;;  %v1275_v22 = vmul.f32 0.25, %v1237_v21  ;;  %v1200_v2 = vmax.f32 %v1162_v39, 0.0  ;;  %v1125_v8 = vmul.f32 %v1792_v61, %v1784_v44  ;;  %v2925_v5 = vpop.xlane.xlu1 %472 }
 0x2b1   :  { %v1796_v46 = vpop.eup %1795  ;;  %v1519_v9 = vadd.f32 %v1518_v18, %v1517_v20  ;;  %1811 = vpow2.f32 %v1031_v15  ;;  %v934_v34 = vsub.f32 %v590_v41, %v2856_v27  ;;  %v591_v44 = vadd.f32 %v530_v16, %v3378_v31 }
 0x2b2   :  { %v1798_v62 = vpop.eup %1797  ;;  %1813 = vrcp.f32 %v2797_v36  ;;  %v1313_v57 = vmul.f32 %v1275_v22, %v933_v43  ;;  %v1238_v14 = vmul.f32 %v1200_v2, %v1200_v2  ;;  %v1163_v10 = vsub.f32 1.0, %v1125_v8 }
 0x2b3   :  { %v2916_v6 = vpop.xlane.xlu0 %865  ;;  %v1800_v37 = vpop.eup %1799  ;;  %1815 = vlog2.f32 %v2808_v56  ;;  %v532_v36 = vmul.f32 0.6931472, %v1788_v28  ;;  %v977_v21 = vsub.f32 %v2907_v33, %v2336_v30  ;;  %v935_v28 = vsub.f32 %v591_v44, %v2866_v29 }
 0x2b4   :  { %v1802_v52 = vpop.eup %1801  ;;  %v1520_v20 = vsel %vm1496_vm0, %v1313_v57, 0.0  ;;  %v1276_v25 = vmul.f32 0.25, %v1238_v14  ;;  %v1201_v17 = vmax.f32 %v1163_v10, 0.0  ;;  %v1126_v38 = vmul.f32 %v1800_v37, %v1790_v23 }
 0x2b5   :  { %v2922_v32 = vpop.eup %1803  ;;  %1817 = vrcp.f32 %v2808_v56  ;;  %v1521_v0 = vadd.f32 %v1520_v20, %v1519_v9  ;;  %v534_v23 = vmul.f32 0.6931472, %v1794_v59  ;;  %v592_v9 = vadd.f32 %v532_v36, %v2417_v51 }
 0x2b6   :  { %1819 = vlog2.f32 %v2820_v3  ;;  %v1314_v27 = vmul.f32 %v1276_v25, %v934_v34  ;;  %v1239_v31 = vmul.f32 %v1201_v17, %v1201_v17  ;;  %v1164_v39 = vsub.f32 1.0, %v1126_v38  ;;  %v2948_v34 = vpop.xlane.xlu1 %475 }
 0x2b7   :  { %v2930_v61 = vpop.xlane.xlu0 %868  ;;  %v1806_v16 = vpop.eup %1805  ;;  %1821 = vrcp.f32 %v2820_v3  ;;  %v1033_v41 = vmul.f32 1.442695, %v977_v21  ;;  %v978_v29 = vsub.f32 %v2916_v6, %v2430_v40  ;;  %v593_v37 = vadd.f32 %v534_v23, %v3379_v54 }
 0x2b8   :  { %v2934_v56 = vpop.eup %1807  ;;  %v1522_v43 = vsel %vm1496_vm0, %v1314_v27, 0.0  ;;  %v1277_v15 = vmul.f32 0.25, %v1239_v31  ;;  %v1202_v18 = vmax.f32 %v1164_v39, 0.0  ;;  %v1127_v22 = vmul.f32 %v1806_v16, %v1796_v46 }
 0x2b9   :  { %v2937_v2 = vpop.eup %1809  ;;  %1823 = vlog2.f32 %v2829_v42  ;;  %v1523_v8 = vadd.f32 %v1522_v43, %v1521_v0  ;;  %v936_v46 = vsub.f32 %v592_v9, %v2876_v7  ;;  %v536_v36 = vmul.f32 0.6931472, %v1798_v62 }
 0x2ba   :  { %v1315_v59 = vmul.f32 %v1277_v15, %v935_v28  ;;  %v1240_v57 = vmul.f32 %v1202_v18, %v1202_v18  ;;  %v1165_v3 = vsub.f32 1.0, %v1127_v22  ;;  %1825 = vrcp.f32 %v2829_v42  ;;  %v2966_v22 = vpop.xlane.xlu1 %478 }
 0x2bb   :  { %v2943_v14 = vpop.xlane.xlu0 %871  ;;  %v1812_v10 = vpop.eup %1811  ;;  %1827 = vpow2.f32 %v1033_v41  ;;  %v979_v42 = vsub.f32 %v2930_v61, %v2344_v48  ;;  %v1035_v54 = vmul.f32 1.442695, %v978_v29  ;;  %v937_v62 = vsub.f32 %v593_v37, %v2887_v60 }
 0x2bc   :  { %v2950_v44 = vpop.eup %1813  ;;  %v1524_v51 = vsel %vm1496_vm0, %v1315_v59, 0.0  ;;  %v1278_v20 = vmul.f32 0.25, %v1240_v57  ;;  %v1203_v25 = vmax.f32 %v1165_v3, 0.0  ;;  %v1128_v17 = vmul.f32 %v1812_v10, %v1802_v52 }
 0x2bd   :  { %v1816_v38 = vpop.eup %1815  ;;  %v1525_v0 = vadd.f32 %v1524_v51, %v1523_v8  ;;  %1829 = vlog2.f32 %v2845_v12  ;;  %v594_v18 = vadd.f32 %v536_v36, %v2425_v13  ;;  %v1037_v8 = vmul.f32 1.442695, %v979_v42 }
 0x2be   :  { %v1316_v21 = vmul.f32 %v1278_v20, %v936_v46  ;;  %v1241_v7 = vmul.f32 %v1203_v25, %v1203_v25  ;;  %v1166_v27 = vsub.f32 1.0, %v1128_v17  ;;  %1831 = vrcp.f32 %v2845_v12 }
 0x2bf   :  { %v2955_v31 = vpop.xlane.xlu0 %874  ;;  %v2957_v39 = vpop.eup %1817  ;;  %1833 = vpow2.f32 %v1035_v54  ;;  %v980_v59 = vsub.f32 %v2943_v14, %v2432_v49  ;;  %v938_v13 = vsub.f32 %v594_v18, %v2898_v47  ;;  %v538_v54 = vmul.f32 0.6931472, %v2922_v32 }
 0x2c0   :  { %v1820_v16 = vpop.eup %1819  ;;  %v1526_v52 = vsel %vm1496_vm0, %v1316_v21, 0.0  ;;  %v1279_v23 = vmul.f32 0.25, %v1241_v7  ;;  %v1204_v28 = vmax.f32 %v1166_v27, 0.0  ;;  %1835 = vlog2.f32 %v2861_v19 }
 0x2c1   :  { %v2962_v43 = vpop.eup %1821  ;;  %v1527_v15 = vadd.f32 %v1526_v52, %v1525_v0  ;;  %1837 = vrcp.f32 %v2861_v19  ;;  %v1039_v37 = vmul.f32 1.442695, %v980_v59  ;;  %v981_v51 = vsub.f32 %v2955_v31, %v2349_v55  ;;  %v2984_v19 = vpop.xlane.xlu1 %481 }
 0x2c2   :  { %v1317_v9 = vmul.f32 %v1279_v23, %v937_v62  ;;  %v1242_v41 = vmul.f32 %v1204_v28, %v1204_v28  ;;  %1839 = vlog2.f32 %v2880_v4  ;;  %v544_v28 = vmul.f32 0.6931472, %v1820_v16 }
 0x2c3   :  { %v2970_v57 = vpop.xlane.xlu0 %877  ;;  %v1824_v60 = vpop.eup %1823  ;;  %1841 = vpow2.f32 %v1037_v8  ;;  %v1041_v42 = vmul.f32 1.442695, %v981_v51 }
 0x2c4   :  { %v1528_v12 = vsel %vm1496_vm0, %v1317_v9, 0.0  ;;  %v1280_v3 = vmul.f32 0.25, %v1242_v41  ;;  %v2976_v29 = vpop.eup %1825  ;;  %1843 = vrcp.f32 %v2880_v4  ;;  %v982_v4 = vsub.f32 %v2970_v57, %v2434_v50 }
 0x2c5   :  { %v1529_v10 = vadd.f32 %v1528_v12, %v1527_v15  ;;  %v1828_v25 = vpop.eup %1827  ;;  %1845 = vlog2.f32 %v2893_v58  ;;  %v3003_v62 = vpop.xlane.xlu1 %484  ;;  %v3015_v9 = vadd.f32 %v538_v54, %v2336_v30  ;;  %v3030_v30 = vadd.f32 %v544_v28, %v2432_v49 }
 0x2c6   :  { %v1318_v46 = vmul.f32 %v1280_v3, %v938_v13  ;;  %1847 = vrcp.f32 %v2893_v58  ;;  %v1129_v0 = vmul.f32 %v1828_v25, %v2934_v56  ;;  %v540_v58 = vmul.f32 0.6931472, %v2937_v2 }
 0x2c7   :  { %v2981_v20 = vpop.xlane.xlu0 %880  ;;  %v1830_v17 = vpop.eup %1829  ;;  %1849 = vpow2.f32 %v1039_v37  ;;  %v542_v56 = vmul.f32 0.6931472, %v1816_v38  ;;  %v1043_v2 = vmul.f32 1.442695, %v982_v4 }
 0x2c8   :  { %v1530_v47 = vsel %vm1496_vm0, %v1318_v46, 0.0  ;;  %v2994_v7 = vpop.eup %1831  ;;  %1851 = vlog2.f32 %v2911_v1  ;;  %v1167_v15 = vsub.f32 1.0, %v1129_v0  ;;  %v3018_v16 = vadd.f32 %v540_v58, %v2430_v40 }
 0x2c9   :  { %v2989_v36 = vadd.f32 %v1530_v47, %v1529_v10  ;;  %v1834_v27 = vpop.eup %1833  ;;  %1853 = vrcp.f32 %v2911_v1  ;;  %v983_v1 = vsub.f32 %v2981_v20, %v2351_v63  ;;  %v3026_v12 = vadd.f32 %v542_v56, %v2344_v48  ;;  %v3037_v51 = vpop.xlane.xlu1 %487 }
 0x2ca   :  { %v1836_v52 = vpop.eup %1835  ;;  %1855 = vlog2.f32 %v2925_v5  ;;  %v1130_v32 = vmul.f32 %v1834_v27, %v2950_v44  ;;  %v548_v44 = vmul.f32 0.6931472, %v1830_v17  ;;  %v1205_v10 = vmax.f32 %v1167_v15, 0.0 }
 0x2cb   :  { %v2992_v21 = vpop.xlane.xlu0 %883  ;;  %v3005_v23 = vpop.eup %1837  ;;  %1857 = vpow2.f32 %v1041_v42  ;;  %v550_v3 = vmul.f32 0.6931472, %v1836_v52  ;;  %v1045_v48 = vmul.f32 1.442695, %v983_v1 }
 0x2cc   :  { %v1840_v8 = vpop.eup %1839  ;;  %1859 = vrcp.f32 %v2925_v5  ;;  %v984_v41 = vsub.f32 %v2992_v21, %v2440_v35  ;;  %v546_v5 = vmul.f32 0.6931472, %v1824_v60  ;;  %v1168_v37 = vsub.f32 1.0, %v1130_v32 }
 0x2cd   :  { %v1842_v38 = vpop.eup %1841  ;;  %1861 = vlog2.f32 %v2948_v34  ;;  %v552_v25 = vmul.f32 0.6931472, %v1840_v8  ;;  %v3055_v54 = vadd.f32 %v550_v3, %v2351_v63  ;;  %v3070_v1 = vpop.xlane.xlu1 %490 }
 0x2ce   :  { %v3022_v59 = vpop.eup %1843  ;;  %1863 = vrcp.f32 %v2948_v34  ;;  %v1131_v60 = vmul.f32 %v1842_v38, %v2957_v39  ;;  %v1047_v47 = vmul.f32 1.442695, %v984_v41  ;;  %v3044_v0 = vadd.f32 %v546_v5, %v2349_v55 }
 0x2cf   :  { %v3007_v18 = vpop.xlane.xlu0 %886  ;;  %v1846_v13 = vpop.eup %1845  ;;  %1865 = vlog2.f32 %v2966_v22  ;;  %v3047_v39 = vadd.f32 %v548_v44, %v2434_v50  ;;  %v1206_v55 = vmax.f32 %v1168_v37, 0.0  ;;  %v3061_v15 = vadd.f32 %v552_v25, %v2440_v35 }
 0x2d0   :  { %v3034_v46 = vpop.eup %1847  ;;  %1867 = vpow2.f32 %v1043_v2  ;;  %v985_v49 = vsub.f32 %v3007_v18, %v2355_v26  ;;  %v554_v27 = vmul.f32 0.6931472, %v1846_v13  ;;  %v1169_v56 = vsub.f32 1.0, %v1131_v60 }
 0x2d1   :  { %v1850_v34 = vpop.eup %1849  ;;  %1869 = vrcp.f32 %v2966_v22  ;;  %v1243_v22 = vmul.f32 %v1205_v10, %v1205_v10  ;;  %v939_v2 = vsub.f32 %v3015_v9, %v2907_v33  ;;  %v1244_v3 = vmul.f32 %v1206_v55, %v1206_v55 }
 0x2d2   :  { %v1852_v17 = vpop.eup %1851  ;;  %1871 = vlog2.f32 %v2984_v19  ;;  %v1132_v50 = vmul.f32 %v1850_v34, %v2962_v43  ;;  %v1049_v8 = vmul.f32 1.442695, %v985_v49  ;;  %v3074_v5 = vadd.f32 %v554_v27, %v2355_v26 }
 0x2d3   :  { %v3032_v40 = vpop.xlane.xlu0 %889  ;;  %v3051_v4 = vpop.eup %1853  ;;  %1873 = vrcp.f32 %v2984_v19  ;;  %v556_v63 = vmul.f32 0.6931472, %v1852_v17  ;;  %v1281_v35 = vmul.f32 0.25, %v1243_v22  ;;  %v1207_v10 = vmax.f32 %v1169_v56, 0.0 }
 0x2d4   :  { %v986_v42 = vsub.f32 %v3032_v40, %v2444_v45  ;;  %v1856_v52 = vpop.eup %1855  ;;  %1875 = vpow2.f32 %v1045_v48  ;;  %v1170_v33 = vsub.f32 1.0, %v1132_v50  ;;  %v940_v60 = vsub.f32 %v3018_v16, %v2916_v6 }
 0x2d5   :  { %v1858_v28 = vpop.eup %1857  ;;  %1877 = vpow2.f32 %v1047_v47  ;;  %v558_v41 = vmul.f32 0.6931472, %v1856_v52  ;;  %v941_v25 = vsub.f32 %v3026_v12, %v2930_v61  ;;  %v3088_v47 = vadd.f32 %v556_v63, %v2444_v45  ;;  %v3098_v12 = vpop.xlane.xlu1 %919 }
 0x2d6   :  { %v3065_v32 = vpop.eup %1859  ;;  %1879 = vlog2.f32 %v3003_v62  ;;  %v1051_v43 = vmul.f32 1.442695, %v986_v42  ;;  %v1133_v9 = vmul.f32 %v1858_v28, %v2976_v29  ;;  %v1319_v29 = vmul.f32 %v1281_v35, %v939_v2 }
 0x2d7   :  { %v3057_v58 = vpop.xlane.xlu0 %892  ;;  %v1862_v38 = vpop.eup %1861  ;;  %1881 = vrcp.f32 %v3003_v62  ;;  %v3094_v6 = vadd.f32 %v558_v41, %v2357_v11  ;;  %v1282_v27 = vmul.f32 0.25, %v1244_v3  ;;  %v1245_v22 = vmul.f32 %v1207_v10, %v1207_v10 }
 0x2d8   :  { %v987_v19 = vsub.f32 %v3057_v58, %v2357_v11  ;;  %v3078_v13 = vpop.eup %1863  ;;  %1883 = vpow2.f32 %v1049_v8  ;;  %v560_v34 = vmul.f32 0.6931472, %v1862_v38  ;;  %v1208_v52 = vmax.f32 %v1170_v33, 0.0 }
 0x2d9   :  { %v1866_v37 = vpop.eup %1865  ;;  %1885 = vpow2.f32 %v1051_v43  ;;  %v1171_v61 = vsub.f32 1.0, %v1133_v9  ;;  %v942_v55 = vsub.f32 %v3030_v30, %v2943_v14  ;;  %v1532_v2 = vsel %vm1496_vm0, %v1319_v29, 0.0 }
 0x2da   :  { %v1053_v48 = vmul.f32 1.442695, %v987_v19  ;;  %v1868_v26 = vpop.eup %1867  ;;  %1887 = vlog2.f32 %v3037_v51  ;;  %v3113_v19 = vadd.f32 %v560_v34, %v2450_v24  ;;  %v1320_v35 = vmul.f32 %v1282_v27, %v940_v60 }
 0x2db   :  { %v3076_v44 = vpop.xlane.xlu0 %895  ;;  %v3090_v49 = vpop.eup %1869  ;;  %v1134_v56 = vmul.f32 %v1868_v26, %v2994_v7  ;;  %v3380_v7 = vld [vmem:[#allocation36_spill] sm:$0xff]  ;;  %v1283_v3 = vmul.f32 0.25, %v1245_v22  ;;  %v1246_v10 = vmul.f32 %v1208_v52, %v1208_v52  ;;  %v1209_v33 = vmax.f32 %v1171_v61, 0.0 }
 0x2dc   :  { %v988_v62 = vsub.f32 %v3076_v44, %v2450_v24  ;;  %v1872_v42 = vpop.eup %1871  ;;  %1889 = vpow2.f32 %v1053_v48  ;;  %v996_v43 = vsub.f32 %v3098_v12, %v3380_v7  ;;  %v562_v34 = vmul.f32 0.6931472, %v1866_v37 }
 0x2dd   :  { %v3100_v45 = vpop.eup %1873  ;;  %1891 = vrcp.f32 %v3037_v51  ;;  %v1172_v48 = vsub.f32 1.0, %v1134_v56  ;;  %v1533_v27 = vadd.f32 %v1532_v2, %v2989_v36  ;;  %v564_v22 = vmul.f32 0.6931472, %v1872_v42 }
 0x2de   :  { %v1055_v16 = vmul.f32 1.442695, %v988_v62  ;;  %v1876_v50 = vpop.eup %1875  ;;  %v3381_v62 = vld [vmem:[#allocation33_spill] sm:$0xff]  ;;  %v1071_v52 = vmul.f32 1.442695, %v996_v43  ;;  %v1534_v56 = vsel %vm1496_vm0, %v1320_v35, 0.0  ;;  %v1247_v37 = vmul.f32 %v1209_v33, %v1209_v33 }
 0x2df   :  { %v3096_v17 = vpop.xlane.xlu0 %898  ;;  %v1878_v63 = vpop.eup %1877  ;;  %v1135_v24 = vmul.f32 %v1876_v50, %v3005_v23  ;;  %v3382_v50 = vld [vmem:[#allocation28_spill] sm:$0xff]  ;;  %v1210_v8 = vmax.f32 %v1172_v48, 0.0  ;;  %v3384_v30 = vsub.f32 %v3044_v0, %v2955_v31  ;;  %v947_v31 = vsub.f32 %v3074_v5, %v3007_v18 }
 0x2e0   :  { %v989_v11 = vsub.f32 %v3096_v17, %v3352_v53  ;;  %1893 = vpow2.f32 %v1055_v16  ;;  %v1880_v51 = vpop.eup %1879  ;;  %v1136_v60 = vmul.f32 %v1878_v63, %v3022_v59  ;;  %v1321_v59 = vmul.f32 %v1283_v3, %v941_v25  ;;  %v497_v48 = vpop.xlane.xlu1 %496 }
 0x2e1   :  { %v3120_v9 = vpop.eup %1881  ;;  %v1284_v63 = vmul.f32 0.25, %v1246_v10  ;;  %v1173_v36 = vsub.f32 1.0, %v1135_v24  ;;  %v1535_v3 = vadd.f32 %v1534_v56, %v1533_v27  ;;  %v1285_v10 = vmul.f32 0.25, %v1247_v37 }
 0x2e2   :  { %v1057_v38 = vmul.f32 1.442695, %v989_v11  ;;  %v1884_v16 = vpop.eup %1883  ;;  %v1174_v42 = vsub.f32 1.0, %v1136_v60  ;;  %v3156_v37 = vmul.f32 0.6931472, %v1880_v51 }
 0x2e3   :  { %v3118_v41 = vpop.xlane.xlu0 %901  ;;  %v1886_v61 = vpop.eup %1885 }
 0x2e4   :  { %1895 = vpow2.f32 %v1057_v38  ;;  %v990_v26 = vsub.f32 %v3118_v41, %v3381_v62  ;;  %v3136_v29 = vpop.eup %1887  ;;  %v1138_v33 = vmul.f32 %v1886_v61, %v3051_v4  ;;  %v1322_v4 = vmul.f32 %v1284_v63, %v942_v55 }
 0x2e5   :  { %1897 = vlog2.f32 %v3070_v1  ;;  %v1323_v55 = vmul.f32 %v1285_v10, %v3384_v30 }
 0x2e6   :  { %1899 = vrcp.f32 %v3070_v1  ;;  %v1059_v11 = vmul.f32 1.442695, %v990_v26  ;;  %v1137_v1 = vmul.f32 %v1884_v16, %v3034_v46  ;;  %v1890_v43 = vpop.eup %1889  ;;  %v3143_v26 = vadd.f32 %v562_v34, %v3352_v53  ;;  %v3383_v46 = vld [vmem:[#allocation34_spill] sm:$0xff] }
 0x2e7   :  { %v3131_v23 = vpop.xlane.xlu0 %904  ;;  %v3147_v25 = vpop.eup %1891  ;;  %v1536_v16 = vsel %vm1496_vm0, %v1321_v59, 0.0  ;;  %v1248_v53 = vmul.f32 %v1210_v8, %v1210_v8  ;;  %v1211_v34 = vmax.f32 %v1173_v36, 0.0  ;;  %v1538_v51 = vsel %vm1496_vm0, %v1322_v4, 0.0  ;;  %v3386_v4 = vld [vmem:[#allocation35_spill] sm:$0xff] }
 0x2e8   :  { %v991_v38 = vsub.f32 %v3131_v23, %v3382_v50  ;;  %1901 = vpow2.f32 %v1059_v11  ;;  %v1175_v61 = vsub.f32 1.0, %v1137_v1  ;;  %v1139_v11 = vmul.f32 %v1890_v43, %v3065_v32 }
 0x2e9   :  { %1903 = vpow2.f32 %v1071_v52  ;;  %v1212_v52 = vmax.f32 %v1174_v42, 0.0  ;;  %v1537_v14 = vadd.f32 %v1536_v16, %v1535_v3  ;;  %v1286_v63 = vmul.f32 0.25, %v1248_v53 }
 0x2ea   :  { %v1061_v2 = vmul.f32 1.442695, %v991_v38  ;;  %v1894_v60 = vpop.eup %1893  ;;  %v1176_v38 = vsub.f32 1.0, %v1138_v33  ;;  %v1249_v36 = vmul.f32 %v1211_v34, %v1211_v34  ;;  %v1213_v1 = vmax.f32 %v1175_v61, 0.0 }
 0x2eb   :  { %v3145_v28 = vpop.xlane.xlu0 %907  ;;  %v1140_v32 = vmul.f32 %v1894_v60, %v3078_v13  ;;  %v1250_v42 = vmul.f32 %v1212_v52, %v1212_v52  ;;  %v1177_v43 = vsub.f32 1.0, %v1139_v11  ;;  %v1540_v60 = vsel %vm1496_vm0, %v1323_v55, 0.0 }
 0x2ec   :  { %1905 = vpow2.f32 %v1061_v2  ;;  %v992_v24 = vsub.f32 %v3145_v28, %v3383_v46  ;;  %v3159_v2 = vadd.f32 %v564_v22, %v3381_v62  ;;  %v3385_v62 = vld [vmem:[#allocation29_spill] sm:$0xff]  ;;  %v1214_v0 = vmax.f32 %v1176_v38, 0.0 }
 0x2ed   :  { %1907 = vlog2.f32 %v497_v48  ;;  %v1178_v16 = vsub.f32 1.0, %v1140_v32  ;;  %v1287_v52 = vmul.f32 0.25, %v1249_v36  ;;  %v1288_v61 = vmul.f32 0.25, %v1250_v42 }
 0x2ee   :  { %v1063_v27 = vmul.f32 1.442695, %v992_v24  ;;  %v1896_v56 = vpop.eup %1895  ;;  %v1539_v24 = vadd.f32 %v1538_v51, %v1537_v14  ;;  %v1251_v11 = vmul.f32 %v1213_v1, %v1213_v1  ;;  %v3189_v38 = vmul.f32 0.6931472, %v3136_v29  ;;  %v3389_v1 = vld [vmem:[#allocation30_spill] sm:$0xff] }
 0x2ef   :  { %v3161_v59 = vpop.xlane.xlu0 %910  ;;  %v3163_v35 = vpop.eup %1897  ;;  %v1141_v33 = vmul.f32 %v1896_v56, %v3090_v49  ;;  %v3387_v49 = vsub.f32 %v3047_v39, %v2970_v57  ;;  %v1252_v14 = vmul.f32 %v1214_v0, %v1214_v0  ;;  %v948_v39 = vsub.f32 %v3088_v47, %v3032_v40 }
 0x2f0   :  { %1909 = vpow2.f32 %v1063_v27  ;;  %v3169_v8 = vpop.eup %1899  ;;  %v993_v22 = vsub.f32 %v3161_v59, %v3385_v62  ;;  %v1215_v27 = vmax.f32 %v1177_v43, 0.0  ;;  %v1541_v57 = vadd.f32 %v1540_v60, %v1539_v24 }
 0x2f1   :  { %1911 = vrcp.f32 %v497_v48  ;;  %v1324_v48 = vmul.f32 %v1286_v63, %v3387_v49  ;;  %v1179_v56 = vsub.f32 1.0, %v1141_v33  ;;  %v3388_v29 = vsub.f32 %v3055_v54, %v2981_v20 }
 0x2f2   :  { %v1065_v13 = vmul.f32 1.442695, %v993_v22  ;;  %v1902_v10 = vpop.eup %1901  ;;  %v3390_v33 = vsub.f32 %v3061_v15, %v2992_v21  ;;  %v1289_v40 = vmul.f32 0.25, %v1251_v11  ;;  %v1253_v47 = vmul.f32 %v1215_v27, %v1215_v27 }
 0x2f3   :  { %v3177_v3 = vpop.xlane.xlu0 %913  ;;  %v3182_v34 = vpop.eup %1903  ;;  %v1142_v18 = vmul.f32 %v1902_v10, %v3100_v45  ;;  %v1216_v45 = vmax.f32 %v1178_v16, 0.0  ;;  %v1542_v36 = vsel %vm1496_vm0, %v1324_v48, 0.0  ;;  %v1325_v22 = vmul.f32 %v1287_v52, %v3388_v29 }
 0x2f4   :  { %v994_v53 = vsub.f32 %v3177_v3, %v3386_v4  ;;  %1913 = vpow2.f32 %v1065_v13  ;;  %v1326_v0 = vmul.f32 %v1288_v61, %v3390_v33  ;;  %v1217_v13 = vmax.f32 %v1179_v56, 0.0 }
 0x2f5   :  { %v1180_v30 = vsub.f32 1.0, %v1142_v18  ;;  %v1290_v10 = vmul.f32 0.25, %v1252_v14  ;;  %v1543_v20 = vadd.f32 %v1542_v36, %v1541_v57  ;;  %v949_v54 = vsub.f32 %v3094_v6, %v3057_v58 }
 0x2f6   :  { %v1906_v5 = vpop.eup %1905  ;;  %v1067_v51 = vmul.f32 1.442695, %v994_v53  ;;  %v1254_v49 = vmul.f32 %v1216_v45, %v1216_v45  ;;  %v1544_v52 = vsel %vm1496_vm0, %v1325_v22, 0.0  ;;  %v1327_v18 = vmul.f32 %v1289_v40, %v947_v31 }
 0x2f7   :  { %v1143_v55 = vmul.f32 %v1906_v5, %v3120_v9  ;;  %v3192_v32 = vpop.xlane.xlu0 %916  ;;  %v3196_v63 = vpop.eup %1907  ;;  %v1218_v24 = vmax.f32 %v1180_v30, 0.0  ;;  %v1291_v5 = vmul.f32 0.25, %v1253_v47  ;;  %v1255_v61 = vmul.f32 %v1217_v13, %v1217_v13 }
 0x2f8   :  { %v995_v9 = vsub.f32 %v3192_v32, %v3389_v1  ;;  %1915 = vpow2.f32 %v1067_v51  ;;  %v1328_v27 = vmul.f32 %v1290_v10, %v948_v39  ;;  %v1292_v58 = vmul.f32 0.25, %v1254_v49 }
 0x2f9   :  { %v1181_v42 = vsub.f32 1.0, %v1143_v55  ;;  %v1256_v56 = vmul.f32 %v1218_v24, %v1218_v24  ;;  %v1545_v55 = vadd.f32 %v1544_v52, %v1543_v20  ;;  %v950_v57 = vsub.f32 %v3113_v19, %v3076_v44 }
 0x2fa   :  { %v1910_v43 = vpop.eup %1909  ;;  %v1069_v16 = vmul.f32 1.442695, %v995_v9  ;;  %v1548_v45 = vsel %vm1496_vm0, %v1327_v18, 0.0  ;;  %v1329_v51 = vmul.f32 %v1291_v5, %v949_v54  ;;  %v1293_v36 = vmul.f32 0.25, %v1255_v61 }
 0x2fb   :  { %v1144_v60 = vmul.f32 %v1910_v43, %v3147_v25  ;;  %v494_v53 = vpop.xlane.xlu0 %493  ;;  %v1912_v48 = vpop.eup %1911  ;;  %v1219_v21 = vmax.f32 %v1181_v42, 0.0  ;;  %v1546_v25 = vsel %vm1496_vm0, %v1326_v0, 0.0  ;;  %v570_v39 = vmul.f32 0.6931472, %v3163_v35 }
 0x2fc   :  { %1917 = vlog2.f32 %v494_v53  ;;  %v1547_v22 = vadd.f32 %v1546_v25, %v1545_v55  ;;  %v951_v42 = vsub.f32 %v3143_v26, %v3096_v17  ;;  %v1294_v9 = vmul.f32 0.25, %v1256_v56 }
 0x2fd   :  { %v1182_v15 = vsub.f32 1.0, %v1144_v60  ;;  %1919 = vpow2.f32 %v1069_v16  ;;  %v1257_v31 = vmul.f32 %v1219_v21, %v1219_v21  ;;  %v1330_v43 = vmul.f32 %v1292_v58, %v950_v57 }
 0x2fe   :  { %v1914_v11 = vpop.eup %1913  ;;  %1921 = vrcp.f32 %v494_v53  ;;  %v1549_v44 = vadd.f32 %v1548_v45, %v1547_v22  ;;  %v952_v19 = vsub.f32 %v3159_v2, %v3118_v41  ;;  %v609_v40 = vadd.f32 %v3156_v37, %v3382_v50 }
 0x2ff   :  { %v500_v14 = vpop.xlane.xlu0 %499  ;;  %v1220_v6 = vmax.f32 %v1182_v15, 0.0  ;;  %v1145_v30 = vmul.f32 %v1914_v11, %v3169_v8  ;;  %v1550_v8 = vsel %vm1496_vm0, %v1328_v27, 0.0  ;;  %v1295_v47 = vmul.f32 0.25, %v1257_v31 }
 0x300   :  { %1923 = vlog2.f32 %v500_v14  ;;  %v1552_v35 = vsel %vm1496_vm0, %v1329_v51, 0.0  ;;  %v1331_v10 = vmul.f32 %v1293_v36, %v951_v42  ;;  %v1551_v26 = vadd.f32 %v1550_v8, %v1549_v44 }
 0x301   :  { %1925 = vrcp.f32 %v500_v14  ;;  %v1183_v29 = vsub.f32 1.0, %v1145_v30  ;;  %v1258_v33 = vmul.f32 %v1220_v6, %v1220_v6  ;;  %v1332_v60 = vmul.f32 %v1294_v9, %v952_v19 }
 0x302   :  { %v1916_v13 = vpop.eup %1915  ;;  %v953_v16 = vsub.f32 %v609_v40, %v3131_v23  ;;  %v610_v53 = vadd.f32 %v3189_v38, %v3383_v46  ;;  %v574_v41 = vmul.f32 0.6931472, %v3196_v63  ;;  %v1554_v2 = vsel %vm1496_vm0, %v1330_v43, 0.0 }
 0x303   :  { %v1221_v0 = vmax.f32 %v1183_v29, 0.0  ;;  %v1296_v50 = vmul.f32 0.25, %v1258_v33  ;;  %v611_v37 = vadd.f32 %v570_v39, %v3385_v62  ;;  %v1553_v49 = vadd.f32 %v1552_v35, %v1551_v26 }
 0x304   :  { %v1333_v52 = vmul.f32 %v1295_v47, %v953_v16  ;;  %v954_v21 = vsub.f32 %v610_v53, %v3145_v28  ;;  %v1556_v23 = vsel %vm1496_vm0, %v1331_v10, 0.0  ;;  %v1558_v63 = vsel %vm1496_vm0, %v1332_v60, 0.0 }
 0x305   :  { %v1259_v24 = vmul.f32 %v1221_v0, %v1221_v0  ;;  %v1555_v11 = vadd.f32 %v1554_v2, %v1553_v49  ;;  %v955_v25 = vsub.f32 %v611_v37, %v3161_v59  ;;  %v3391_v30 = vlaneseq }
 0x306   :  { %v1918_v17 = vpop.eup %1917  ;;  %v1334_v62 = vmul.f32 %v1296_v50, %v954_v21  ;;  %v613_v59 = vadd.f32 %v574_v41, %v3389_v1  ;;  %v1960_v53 = vmov 0.0  }
 0x307   :  { %v1920_v20 = vpop.eup %1919  ;;  %v1297_v5 = vmul.f32 0.25, %v1259_v24  ;;  %v572_v61 = vmul.f32 0.6931472, %v1918_v17  ;;  %v1557_v28 = vadd.f32 %v1556_v23, %v1555_v11  ;;  %v1342_v55 = vshrl.u32 %v3391_v30, 7  ;;  %81 = vst.msk [vmem:[#allocation2] sm:$0x1] %vm80_vm10, %v1960_v53 }
 0x308   :  { %v1922_v54 = vpop.eup %1921  ;;  %v1147_v15 = vmul.f32 %v1920_v20, %v1912_v48  ;;  %v1560_v48 = vsel %vm1496_vm0, %v1333_v52, 0.0  ;;  %v1562_v39 = vsel %vm1496_vm0, %v1334_v62, 0.0  ;;  %v957_v8 = vsub.f32 %v613_v59, %v3192_v32 }
 0x309   :  { %v1146_v46 = vmul.f32 %v1922_v54, %v1916_v13  ;;  %v1335_v57 = vmul.f32 %v1297_v5, %v955_v25  ;;  %v612_v31 = vadd.f32 %v572_v61, %v3386_v4  ;;  %v1559_v36 = vadd.f32 %v1558_v63, %v1557_v28 }
 0x30a   :  { %v1924_v18 = vpop.eup %1923  ;;  %v1185_v27 = vsub.f32 1.0, %v1147_v15  ;;  %v1379_v33 = vadd.s32 296, %v1342_v55 }
 0x30b   :  { %v1926_v38 = vpop.eup %1925  ;;  %v1184_v56 = vsub.f32 1.0, %v1146_v46  ;;  %v576_v14 = vmul.f32 0.6931472, %v1924_v18  ;;  %v1561_v9 = vadd.f32 %v1560_v48, %v1559_v36  ;;  %v1564_v0 = vsel %vm1496_vm0, %v1335_v57, 0.0 }
 0x30c   :  { %v1148_v58 = vmul.f32 %v1926_v38, %v3182_v34  ;;  %v1223_v6 = vmax.f32 %v1185_v27, 0.0  ;;  %v956_v4 = vsub.f32 %v612_v31, %v3177_v3  ;;  %vm1456_vm9 = vcmp.lt.s32.totalorder %v1379_v33, 300 }
 0x30d   :  { %v1222_v45 = vmax.f32 %v1184_v56, 0.0  ;;  %v614_v34 = vadd.f32 %v576_v14, %v3380_v7  ;;  %v1563_v40 = vadd.f32 %v1562_v39, %v1561_v9 }
 0x30e   :  { %v1186_v51 = vsub.f32 1.0, %v1148_v58  ;;  %v1261_v29 = vmul.f32 %v1223_v6, %v1223_v6  ;;  %v1495_v49 = vld [vmem:[#allocation2] sm:$0x1] }
 0x30f   :  { %v1260_v22 = vmul.f32 %v1222_v45, %v1222_v45  ;;  %v958_v13 = vsub.f32 %v614_v34, %v3098_v12  ;;  %v1565_v10 = vadd.f32 %v1564_v0, %v1563_v40 }
 0x310   :  { %v1224_v42 = vmax.f32 %v1186_v51, 0.0  ;;  %v1299_v43 = vmul.f32 0.25, %v1261_v29 }
 0x311   :  { %v1298_v44 = vmul.f32 0.25, %v1260_v22 }
 0x312   :  { %v1262_v19 = vmul.f32 %v1224_v42, %v1224_v42  ;;  %v1337_v1 = vmul.f32 %v1299_v43, %v957_v8 }
 0x313   :  { %v1336_v47 = vmul.f32 %v1298_v44, %v956_v4 }
 0x314   :  { %v1300_v35 = vmul.f32 0.25, %v1262_v19  ;;  %v1568_v17 = vsel %vm1496_vm0, %v1337_v1, 0.0 }
 0x315   :  { %v1566_v24 = vsel %vm1496_vm0, %v1336_v47, 0.0 }
 0x316   :  { %v1338_v7 = vmul.f32 %v1300_v35, %v958_v13  ;;  %v1567_v32 = vadd.f32 %v1566_v24, %v1565_v10 }
 0x318   :  { %v1494_v26 = vsel %vm1456_vm9, %v1338_v7, 0.0  ;;  %v1569_v60 = vadd.f32 %v1568_v17, %v1567_v32 }
 0x319   :  { %v1570_v3 = vsel %vm1496_vm0, %v1494_v26, 0.0 }
 0x31a   :  { %v1571_v16 = vadd.f32 %v1570_v3, %v1569_v60 }
 0x31c   :  { %1572 = vadd.xlane.f32.xlu1 %v1571_v16 }
 0x3a9   :  { %v1573_v12 = vpop.xlane.xlu1 %1572 }
 0x3aa   :  { %v1574_v20 = vrot.slane %v1573_v12, 4 }
 0x3ac   :  { %v1575_v41 = vadd.f32 %v1574_v20, %v1573_v12 }
 0x3ae   :  { %v1576_v2 = vrot.slane %v1575_v41, 2 }
 0x3b0   :  { %v1577_v50 = vadd.f32 %v1576_v2, %v1575_v41 }
 0x3b2   :  { %v1578_v37 = vrot.slane %v1577_v50, 1 }
 0x3b4   :  { %v1579_v54 = vadd.f32 %v1578_v37, %v1577_v50 }
 0x3b6   :  { %1616 = vpush %v1579_v54 }
 0x3e7   :  { %s1617_s0 = spop %1616 }
 0x3e8   :  { %v1581_v52 = vstv %s1617_s0 }
 0x3e9   :  { %v1582_v21 = vadd.f32 %v1581_v52, %v1495_v49 }
 0x3eb   :  { %1584 = vst.msk [vmem:[#allocation2] sm:$0x1] %vm80_vm10, %v1582_v21 }
 0x3f2   :  { %v1588_v15 = vld [vmem:[#allocation2] sm:$0x1] }
 0x3f3   :  { %1589 = vst.msk [vmem:[#allocation3] sm:$0x1] %vm80_vm10, %v1588_v15 }
 0x3f4   :  { %1946 = shalt.err (!%p1943_p4)
}
 0x3f5   :  { %s1947_s14 = scalar_lea.hbm %s3266_s2, 16 }
 0x3f6   :  { %p1948_p5 = scmp.ne.s32.totalorder %s3266_s2, %s1947_s14  ;;  %p1951_p6 = scmp.lt.u32.totalorder %s1947_s14, %s3266_s2 }
 0x3f8   :  { %p1953_p7 = pnand %p1951_p6, %p1948_p5 }
 0x3fa   :  { %1956 = shalt.err (!%p1953_p7)
}
 0x3fb   :  { %1599 = dma.vmem_to_hbm [thread:$0]  %s1597_s9, 16, %s3266_s2, [#allocation4]  }
 0x3fc   :  { %1957 = dma.done.wait [#allocation4], 16  }
 0x3fd   :  { %1958 = vsyncadd [#allocation4], 4294967280 }
 0x3fe   :  { %1603 = vsyncpa [#allocation4], 1 }

</bundles_post_ra>
